<compile_context>
chip_gen: v6e
topology: v6e:2x2x1
jax: 0.10.0
libtpu: 0.0.40
codegen_flags: <defaults>
</compile_context>

<pallas_src>
import functools

import jax
import jax.numpy as jnp
from jax.experimental import pallas as pl
from jax.experimental.pallas import tpu as pltpu


def siamese_lstm_kernel(x_ref, w_ih_ref, w_hh_ref, b_ref,
                        fcq_ref, fci_ref, fcb_ref, out_ref, xproj_ref,
                        *, seq_len, stacked_batch):
    T = seq_len
    BP = stacked_batch
    HP = w_hh_ref.shape[0]
    B = out_ref.shape[0]

    # Hoisted input projection: one big MXU matmul + bias, out of the recurrence.
    #   x_ref: (T*BP, E) bf16, w_ih: (E, 4*HP) bf16 -> f32 accum.
    xproj_ref[...] = (
        jnp.dot(x_ref[...], w_ih_ref[...], preferred_element_type=jnp.float32)
        + b_ref[...])                                        # (T*BP, 4*HP) f32

    w_hh = w_hh_ref[...]                                     # (HP, 4*HP) bf16

    def step(t, carry):
        h, c = carry                                         # (BP, HP) f32
        row = pl.multiple_of(t * BP, BP)
        gates = (xproj_ref[pl.ds(row, BP), :]
                 + jnp.dot(h.astype(jnp.bfloat16), w_hh,
                           preferred_element_type=jnp.float32))   # (BP, 4*HP)
        # HP is a multiple of 128 -> each gate slice is lane-aligned (full vregs).
        i_g = jax.nn.sigmoid(gates[:, 0 * HP:1 * HP])
        f_g = jax.nn.sigmoid(gates[:, 1 * HP:2 * HP])
        g_g = jnp.tanh(gates[:, 2 * HP:3 * HP])
        o_g = jax.nn.sigmoid(gates[:, 3 * HP:4 * HP])
        c_new = f_g * c + i_g * g_g
        h_new = o_g * jnp.tanh(c_new)
        return (h_new, c_new)

    h0 = jnp.zeros((BP, HP), jnp.float32)
    c0 = jnp.zeros((BP, HP), jnp.float32)
    h_final, _ = jax.lax.fori_loop(0, T, step, (h0, c0), unroll=True)

    # Rows [0:B] are the query encodings, [B:2B] the input encodings.
    hq = h_final[0:B, :]
    hi = h_final[B:2 * B, :]
    # fc1 on the (implicit) concat, as two MXU pushes (no lane-dim concat/copy).
    out_ref[...] = (
        jnp.dot(hq.astype(jnp.bfloat16), fcq_ref[...],
                preferred_element_type=jnp.float32)
        + jnp.dot(hi.astype(jnp.bfloat16), fci_ref[...],
                  preferred_element_type=jnp.float32)
        + fcb_ref[...])                                      # (B, CP) lane-dense


def siamese_lstm_forward(query_ids, input_ids, lengths, params):
    del lengths  # unused, matches the PyTorch forward()
    B, T = query_ids.shape
    E = params["w_ih"].shape[0]
    H = params["w_hh"].shape[0]
    C = params["fc_w"].shape[1]

    HP = 128 * pl.cdiv(H, 128)        # gate-aligned hidden dim
    CP = 128 * pl.cdiv(C, 128)        # lane-dense output
    BP = 8 * pl.cdiv(2 * B, 8)        # stacked + sublane-padded batch

    # Embedding lookup (glue; gather) and batch-stacking of the two branches.
    xq = jnp.take(params["query_embed"], query_ids, axis=0)      # (B, T, E)
    xi = jnp.take(params["input_embed"], input_ids, axis=0)      # (B, T, E)
    x = jnp.concatenate([xq, xi], axis=0)                        # (2B, T, E)
    x = jnp.transpose(x, (1, 0, 2))                              # (T, 2B, E)
    x = jnp.pad(x, ((0, 0), (0, BP - 2 * B), (0, 0)))            # (T, BP, E)
    x = x.reshape(T * BP, E).astype(jnp.bfloat16)                # time-major rows

    # Pad LSTM weights gate-wise so each gate occupies a full HP-lane block.
    def pad_gate_cols(w):                                        # (in, 4H) -> (in, 4HP)
        w4 = w.reshape(w.shape[0], 4, H)
        w4 = jnp.pad(w4, ((0, 0), (0, 0), (0, HP - H)))
        return w4.reshape(w.shape[0], 4 * HP)

    w_ih = pad_gate_cols(params["w_ih"]).astype(jnp.bfloat16)            # (E, 4HP)
    w_hh = jnp.pad(pad_gate_cols(params["w_hh"]),
                   ((0, HP - H), (0, 0))).astype(jnp.bfloat16)           # (HP, 4HP)
    b = pad_gate_cols(params["b"]).astype(jnp.float32)                   # (1, 4HP)

    fc_w = params["fc_w"]                                                # (2H, C)
    fcq = jnp.pad(fc_w[:H], ((0, HP - H), (0, CP - C))).astype(jnp.bfloat16)
    fci = jnp.pad(fc_w[H:], ((0, HP - H), (0, CP - C))).astype(jnp.bfloat16)
    fcb = jnp.pad(params["fc_b"], ((0, 0), (0, CP - C))).astype(jnp.float32)

    vmem = pl.BlockSpec(memory_space=pltpu.MemorySpace.VMEM)
    kernel = functools.partial(siamese_lstm_kernel, seq_len=T, stacked_batch=BP)
    out = pl.pallas_call(
        kernel,
        out_shape=jax.ShapeDtypeStruct((B, CP), jnp.float32),
        in_specs=[vmem] * 7,
        out_specs=vmem,
        scratch_shapes=[pltpu.VMEM((T * BP, 4 * HP), jnp.float32)],
        compiler_params=pltpu.CompilerParams(
            vmem_limit_bytes=32 * 1024 * 1024),
    )(x, w_ih, w_hh, b, fcq, fci, fcb)
    return out[:, :C]


def init_params(key, query_vocab_len, input_vocab_len, embed_dim, hidden_dim,
                target_class):
    ks = jax.random.split(key, 8)
    H = hidden_dim
    E = embed_dim
    lstm_bound = 1.0 / jnp.sqrt(jnp.float32(H))
    fc_bound = 1.0 / jnp.sqrt(jnp.float32(2 * H))

    params = {
        # nn.Embedding init: uniform(-0.25, 0.25)  (args.mode == 'rand')
        "query_embed": jax.random.uniform(ks[0], (query_vocab_len, E),
                                          jnp.float32, -0.25, 0.25),
        "input_embed": jax.random.uniform(ks[1], (input_vocab_len, E),
                                          jnp.float32, -0.25, 0.25),
        # LSTM weights (transposed layout: (in, 4H)), gate order i|f|g|o,
        # PyTorch uniform(-1/sqrt(H), 1/sqrt(H))
        "w_ih": jax.random.uniform(ks[2], (E, 4 * H), jnp.float32,
                                   -lstm_bound, lstm_bound),
        "w_hh": jax.random.uniform(ks[3], (H, 4 * H), jnp.float32,
                                   -lstm_bound, lstm_bound),
        # combined bias b_ih + b_hh
        "b": (jax.random.uniform(ks[4], (1, 4 * H), jnp.float32,
                                 -lstm_bound, lstm_bound)
              + jax.random.uniform(ks[5], (1, 4 * H), jnp.float32,
                                   -lstm_bound, lstm_bound)),
        # fc1: Linear(2*hidden_dim, target_class)  (non-bidirectional branch)
        "fc_w": jax.random.uniform(ks[6], (2 * H, target_class), jnp.float32,
                                   -fc_bound, fc_bound),
        "fc_b": jax.random.uniform(ks[7], (1, target_class), jnp.float32,
                                   -fc_bound, fc_bound),
    }
    return params


if __name__ == "__main__":
    # Small, deterministic configuration.
    B, T = 2, 8
    embed_dim = 32
    hidden_dim = 32
    target_class = 3
    query_vocab_len = 50
    input_vocab_len = 60

    key = jax.random.PRNGKey(0)
    k_param, k_q, k_i = jax.random.split(key, 3)

    params = init_params(k_param, query_vocab_len, input_vocab_len,
                         embed_dim, hidden_dim, target_class)

    query_ids = jax.random.randint(k_q, (B, T), 0, query_vocab_len,
                                   dtype=jnp.int32)
    input_ids = jax.random.randint(k_i, (B, T), 0, input_vocab_len,
                                   dtype=jnp.int32)
    lengths = jnp.full((B,), T, dtype=jnp.int32)  # unused, matches forward()

    out = siamese_lstm_forward(query_ids, input_ids, lengths, params)
    jax.block_until_ready(out)
    assert out.shape == (B, target_class)
    print("KERNEL_OK")
</pallas_src>

<mosaic_0001>
module attributes {stable_mosaic.version = 11 : i64} {
  func.func @siamese_lstm_kernel(%arg0: memref<64x32xbf16, #tpu.memory_space<vmem>>, %arg1: memref<32x512xbf16, #tpu.memory_space<vmem>>, %arg2: memref<128x512xbf16, #tpu.memory_space<vmem>>, %arg3: memref<1x512xf32, #tpu.memory_space<vmem>>, %arg4: memref<128x128xbf16, #tpu.memory_space<vmem>>, %arg5: memref<128x128xbf16, #tpu.memory_space<vmem>>, %arg6: memref<1x128xf32, #tpu.memory_space<vmem>>, %arg7: memref<2x128xf32, #tpu.memory_space<vmem>>, %arg8: memref<64x512xf32, #tpu.memory_space<vmem>>) attributes {dimension_semantics = [], scalar_prefetch = 0 : i64, scratch_operands = 1 : i64, tpu.core_type = #tpu.core_type<tc>} {
    %c0 = arith.constant 0 : index
    %c0_0 = arith.constant 0 : index
    %0 = vector.load %arg0[%c0, %c0_0] : memref<64x32xbf16, #tpu.memory_space<vmem>>, vector<64x32xbf16>
    %c0_1 = arith.constant 0 : index
    %c0_2 = arith.constant 0 : index
    %1 = vector.load %arg1[%c0_1, %c0_2] : memref<32x512xbf16, #tpu.memory_space<vmem>>, vector<32x512xbf16>
    %cst = arith.constant dense<0.000000e+00> : vector<64x512xf32>
    %2 = tpu.matmul %0, %1, %cst {dimension_numbers = #tpu.dot_dimension_numbers<[1], [0], [0], [1], [0, 0, 1, 1], [], []>} : vector<64x32xbf16>, vector<32x512xbf16>, vector<64x512xf32> -> vector<64x512xf32>
    %c0_3 = arith.constant 0 : index
    %c0_4 = arith.constant 0 : index
    %3 = vector.load %arg3[%c0_3, %c0_4] : memref<1x512xf32, #tpu.memory_space<vmem>>, vector<1x512xf32>
    %4 = vector.broadcast %3 : vector<1x512xf32> to vector<64x512xf32>
    %5 = arith.addf %2, %4 : vector<64x512xf32>
    %c0_5 = arith.constant 0 : index
    %c0_6 = arith.constant 0 : index
    %6 = vector.load %arg8[%c0_5, %c0_6] : memref<64x512xf32, #tpu.memory_space<vmem>>, vector<64x512xf32>
    tpu.vector_store %arg8[%c0_5, %c0_6], %5 {strides = array<i32>} : memref<64x512xf32, #tpu.memory_space<vmem>>, vector<64x512xf32>,
    %c0_7 = arith.constant 0 : index
    %c0_8 = arith.constant 0 : index
    %7 = vector.load %arg2[%c0_7, %c0_8] : memref<128x512xbf16, #tpu.memory_space<vmem>>, vector<128x512xbf16>
    %cst_9 = arith.constant 0.000000e+00 : f32
    %8 = vector.broadcast %cst_9 : f32 to vector<8x128xf32>
    %cst_10 = arith.constant 0.000000e+00 : f32
    %9 = vector.broadcast %cst_10 : f32 to vector<8x128xf32>
    %c0_i32 = arith.constant 0 : i32
    %c8_i32 = arith.constant 8 : i32
    %10 = arith.muli %c0_i32, %c8_i32 : i32
    %11 = tpu.assume_multiple %10, 8 : i32
    %12 = arith.index_cast %11 : i32 to index
    %c0_11 = arith.constant 0 : index
    %13 = vector.load %arg8[%12, %c0_11] : memref<64x512xf32, #tpu.memory_space<vmem>>, vector<8x512xf32>
    %14 = arith.truncf %8 : vector<8x128xf32> to vector<8x128xbf16>
    %cst_12 = arith.constant dense<0.000000e+00> : vector<8x512xf32>
    %15 = tpu.matmul %14, %7, %cst_12 {dimension_numbers = #tpu.dot_dimension_numbers<[1], [0], [0], [1], [0, 0, 1, 1], [], []>} : vector<8x128xbf16>, vector<128x512xbf16>, vector<8x512xf32> -> vector<8x512xf32>
    %16 = arith.addf %13, %15 : vector<8x512xf32>
    %17 = vector.extract_strided_slice %16 {offsets = [0, 0], sizes = [8, 128], strides = [1, 1]} : vector<8x512xf32> to vector<8x128xf32>
    %18 = arith.negf %17 : vector<8x128xf32>
    %19 = math.exp %18 : vector<8x128xf32>
    %cst_13 = arith.constant 1.000000e+00 : f32
    %20 = vector.broadcast %cst_13 : f32 to vector<8x128xf32>
    %21 = arith.addf %20, %19 : vector<8x128xf32>
    %22 = arith.divf %20, %21 : vector<8x128xf32>
    %23 = vector.extract_strided_slice %16 {offsets = [0, 128], sizes = [8, 128], strides = [1, 1]} : vector<8x512xf32> to vector<8x128xf32>
    %24 = arith.negf %23 : vector<8x128xf32>
    %25 = math.exp %24 : vector<8x128xf32>
    %cst_14 = arith.constant 1.000000e+00 : f32
    %26 = vector.broadcast %cst_14 : f32 to vector<8x128xf32>
    %27 = arith.addf %26, %25 : vector<8x128xf32>
    %28 = arith.divf %26, %27 : vector<8x128xf32>
    %29 = vector.extract_strided_slice %16 {offsets = [0, 256], sizes = [8, 128], strides = [1, 1]} : vector<8x512xf32> to vector<8x128xf32>
    %30 = math.tanh %29 : vector<8x128xf32>
    %31 = vector.extract_strided_slice %16 {offsets = [0, 384], sizes = [8, 128], strides = [1, 1]} : vector<8x512xf32> to vector<8x128xf32>
    %32 = arith.negf %31 : vector<8x128xf32>
    %33 = math.exp %32 : vector<8x128xf32>
    %cst_15 = arith.constant 1.000000e+00 : f32
    %34 = vector.broadcast %cst_15 : f32 to vector<8x128xf32>
    %35 = arith.addf %34, %33 : vector<8x128xf32>
    %36 = arith.divf %34, %35 : vector<8x128xf32>
    %37 = arith.mulf %28, %9 : vector<8x128xf32>
    %38 = arith.mulf %22, %30 : vector<8x128xf32>
    %39 = arith.addf %37, %38 : vector<8x128xf32>
    %40 = math.tanh %39 : vector<8x128xf32>
    %41 = arith.mulf %36, %40 : vector<8x128xf32>
    %c1_i32 = arith.constant 1 : i32
    %c8_i32_16 = arith.constant 8 : i32
    %42 = arith.muli %c1_i32, %c8_i32_16 : i32
    %43 = tpu.assume_multiple %42, 8 : i32
    %44 = arith.index_cast %43 : i32 to index
    %c0_17 = arith.constant 0 : index
    %45 = vector.load %arg8[%44, %c0_17] : memref<64x512xf32, #tpu.memory_space<vmem>>, vector<8x512xf32>
    %46 = arith.truncf %41 : vector<8x128xf32> to vector<8x128xbf16>
    %cst_18 = arith.constant dense<0.000000e+00> : vector<8x512xf32>
    %47 = tpu.matmul %46, %7, %cst_18 {dimension_numbers = #tpu.dot_dimension_numbers<[1], [0], [0], [1], [0, 0, 1, 1], [], []>} : vector<8x128xbf16>, vector<128x512xbf16>, vector<8x512xf32> -> vector<8x512xf32>
    %48 = arith.addf %45, %47 : vector<8x512xf32>
    %49 = vector.extract_strided_slice %48 {offsets = [0, 0], sizes = [8, 128], strides = [1, 1]} : vector<8x512xf32> to vector<8x128xf32>
    %50 = arith.negf %49 : vector<8x128xf32>
    %51 = math.exp %50 : vector<8x128xf32>
    %cst_19 = arith.constant 1.000000e+00 : f32
    %52 = vector.broadcast %cst_19 : f32 to vector<8x128xf32>
    %53 = arith.addf %52, %51 : vector<8x128xf32>
    %54 = arith.divf %52, %53 : vector<8x128xf32>
    %55 = vector.extract_strided_slice %48 {offsets = [0, 128], sizes = [8, 128], strides = [1, 1]} : vector<8x512xf32> to vector<8x128xf32>
    %56 = arith.negf %55 : vector<8x128xf32>
    %57 = math.exp %56 : vector<8x128xf32>
    %cst_20 = arith.constant 1.000000e+00 : f32
    %58 = vector.broadcast %cst_20 : f32 to vector<8x128xf32>
    %59 = arith.addf %58, %57 : vector<8x128xf32>
    %60 = arith.divf %58, %59 : vector<8x128xf32>
    %61 = vector.extract_strided_slice %48 {offsets = [0, 256], sizes = [8, 128], strides = [1, 1]} : vector<8x512xf32> to vector<8x128xf32>
    %62 = math.tanh %61 : vector<8x128xf32>
    %63 = vector.extract_strided_slice %48 {offsets = [0, 384], sizes = [8, 128], strides = [1, 1]} : vector<8x512xf32> to vector<8x128xf32>
    %64 = arith.negf %63 : vector<8x128xf32>
    %65 = math.exp %64 : vector<8x128xf32>
    %cst_21 = arith.constant 1.000000e+00 : f32
    %66 = vector.broadcast %cst_21 : f32 to vector<8x128xf32>
    %67 = arith.addf %66, %65 : vector<8x128xf32>
    %68 = arith.divf %66, %67 : vector<8x128xf32>
    %69 = arith.mulf %60, %39 : vector<8x128xf32>
    %70 = arith.mulf %54, %62 : vector<8x128xf32>
    %71 = arith.addf %69, %70 : vector<8x128xf32>
    %72 = math.tanh %71 : vector<8x128xf32>
    %73 = arith.mulf %68, %72 : vector<8x128xf32>
    %c2_i32 = arith.constant 2 : i32
    %c8_i32_22 = arith.constant 8 : i32
    %74 = arith.muli %c2_i32, %c8_i32_22 : i32
    %75 = tpu.assume_multiple %74, 8 : i32
    %76 = arith.index_cast %75 : i32 to index
    %c0_23 = arith.constant 0 : index
    %77 = vector.load %arg8[%76, %c0_23] : memref<64x512xf32, #tpu.memory_space<vmem>>, vector<8x512xf32>
    %78 = arith.truncf %73 : vector<8x128xf32> to vector<8x128xbf16>
    %cst_24 = arith.constant dense<0.000000e+00> : vector<8x512xf32>
    %79 = tpu.matmul %78, %7, %cst_24 {dimension_numbers = #tpu.dot_dimension_numbers<[1], [0], [0], [1], [0, 0, 1, 1], [], []>} : vector<8x128xbf16>, vector<128x512xbf16>, vector<8x512xf32> -> vector<8x512xf32>
    %80 = arith.addf %77, %79 : vector<8x512xf32>
    %81 = vector.extract_strided_slice %80 {offsets = [0, 0], sizes = [8, 128], strides = [1, 1]} : vector<8x512xf32> to vector<8x128xf32>
    %82 = arith.negf %81 : vector<8x128xf32>
    %83 = math.exp %82 : vector<8x128xf32>
    %cst_25 = arith.constant 1.000000e+00 : f32
    %84 = vector.broadcast %cst_25 : f32 to vector<8x128xf32>
    %85 = arith.addf %84, %83 : vector<8x128xf32>
    %86 = arith.divf %84, %85 : vector<8x128xf32>
    %87 = vector.extract_strided_slice %80 {offsets = [0, 128], sizes = [8, 128], strides = [1, 1]} : vector<8x512xf32> to vector<8x128xf32>
    %88 = arith.negf %87 : vector<8x128xf32>
    %89 = math.exp %88 : vector<8x128xf32>
    %cst_26 = arith.constant 1.000000e+00 : f32
    %90 = vector.broadcast %cst_26 : f32 to vector<8x128xf32>
    %91 = arith.addf %90, %89 : vector<8x128xf32>
    %92 = arith.divf %90, %91 : vector<8x128xf32>
    %93 = vector.extract_strided_slice %80 {offsets = [0, 256], sizes = [8, 128], strides = [1, 1]} : vector<8x512xf32> to vector<8x128xf32>
    %94 = math.tanh %93 : vector<8x128xf32>
    %95 = vector.extract_strided_slice %80 {offsets = [0, 384], sizes = [8, 128], strides = [1, 1]} : vector<8x512xf32> to vector<8x128xf32>
    %96 = arith.negf %95 : vector<8x128xf32>
    %97 = math.exp %96 : vector<8x128xf32>
    %cst_27 = arith.constant 1.000000e+00 : f32
    %98 = vector.broadcast %cst_27 : f32 to vector<8x128xf32>
    %99 = arith.addf %98, %97 : vector<8x128xf32>
    %100 = arith.divf %98, %99 : vector<8x128xf32>
    %101 = arith.mulf %92, %71 : vector<8x128xf32>
    %102 = arith.mulf %86, %94 : vector<8x128xf32>
    %103 = arith.addf %101, %102 : vector<8x128xf32>
    %104 = math.tanh %103 : vector<8x128xf32>
    %105 = arith.mulf %100, %104 : vector<8x128xf32>
    %c3_i32 = arith.constant 3 : i32
    %c8_i32_28 = arith.constant 8 : i32
    %106 = arith.muli %c3_i32, %c8_i32_28 : i32
    %107 = tpu.assume_multiple %106, 8 : i32
    %108 = arith.index_cast %107 : i32 to index
    %c0_29 = arith.constant 0 : index
    %109 = vector.load %arg8[%108, %c0_29] : memref<64x512xf32, #tpu.memory_space<vmem>>, vector<8x512xf32>
    %110 = arith.truncf %105 : vector<8x128xf32> to vector<8x128xbf16>
    %cst_30 = arith.constant dense<0.000000e+00> : vector<8x512xf32>
    %111 = tpu.matmul %110, %7, %cst_30 {dimension_numbers = #tpu.dot_dimension_numbers<[1], [0], [0], [1], [0, 0, 1, 1], [], []>} : vector<8x128xbf16>, vector<128x512xbf16>, vector<8x512xf32> -> vector<8x512xf32>
    %112 = arith.addf %109, %111 : vector<8x512xf32>
    %113 = vector.extract_strided_slice %112 {offsets = [0, 0], sizes = [8, 128], strides = [1, 1]} : vector<8x512xf32> to vector<8x128xf32>
    %114 = arith.negf %113 : vector<8x128xf32>
    %115 = math.exp %114 : vector<8x128xf32>
    %cst_31 = arith.constant 1.000000e+00 : f32
    %116 = vector.broadcast %cst_31 : f32 to vector<8x128xf32>
    %117 = arith.addf %116, %115 : vector<8x128xf32>
    %118 = arith.divf %116, %117 : vector<8x128xf32>
    %119 = vector.extract_strided_slice %112 {offsets = [0, 128], sizes = [8, 128], strides = [1, 1]} : vector<8x512xf32> to vector<8x128xf32>
    %120 = arith.negf %119 : vector<8x128xf32>
    %121 = math.exp %120 : vector<8x128xf32>
    %cst_32 = arith.constant 1.000000e+00 : f32
    %122 = vector.broadcast %cst_32 : f32 to vector<8x128xf32>
    %123 = arith.addf %122, %121 : vector<8x128xf32>
    %124 = arith.divf %122, %123 : vector<8x128xf32>
    %125 = vector.extract_strided_slice %112 {offsets = [0, 256], sizes = [8, 128], strides = [1, 1]} : vector<8x512xf32> to vector<8x128xf32>
    %126 = math.tanh %125 : vector<8x128xf32>
    %127 = vector.extract_strided_slice %112 {offsets = [0, 384], sizes = [8, 128], strides = [1, 1]} : vector<8x512xf32> to vector<8x128xf32>
    %128 = arith.negf %127 : vector<8x128xf32>
    %129 = math.exp %128 : vector<8x128xf32>
    %cst_33 = arith.constant 1.000000e+00 : f32
    %130 = vector.broadcast %cst_33 : f32 to vector<8x128xf32>
    %131 = arith.addf %130, %129 : vector<8x128xf32>
    %132 = arith.divf %130, %131 : vector<8x128xf32>
    %133 = arith.mulf %124, %103 : vector<8x128xf32>
    %134 = arith.mulf %118, %126 : vector<8x128xf32>
    %135 = arith.addf %133, %134 : vector<8x128xf32>
    %136 = math.tanh %135 : vector<8x128xf32>
    %137 = arith.mulf %132, %136 : vector<8x128xf32>
    %c4_i32 = arith.constant 4 : i32
    %c8_i32_34 = arith.constant 8 : i32
    %138 = arith.muli %c4_i32, %c8_i32_34 : i32
    %139 = tpu.assume_multiple %138, 8 : i32
    %140 = arith.index_cast %139 : i32 to index
    %c0_35 = arith.constant 0 : index
    %141 = vector.load %arg8[%140, %c0_35] : memref<64x512xf32, #tpu.memory_space<vmem>>, vector<8x512xf32>
    %142 = arith.truncf %137 : vector<8x128xf32> to vector<8x128xbf16>
    %cst_36 = arith.constant dense<0.000000e+00> : vector<8x512xf32>
    %143 = tpu.matmul %142, %7, %cst_36 {dimension_numbers = #tpu.dot_dimension_numbers<[1], [0], [0], [1], [0, 0, 1, 1], [], []>} : vector<8x128xbf16>, vector<128x512xbf16>, vector<8x512xf32> -> vector<8x512xf32>
    %144 = arith.addf %141, %143 : vector<8x512xf32>
    %145 = vector.extract_strided_slice %144 {offsets = [0, 0], sizes = [8, 128], strides = [1, 1]} : vector<8x512xf32> to vector<8x128xf32>
    %146 = arith.negf %145 : vector<8x128xf32>
    %147 = math.exp %146 : vector<8x128xf32>
    %cst_37 = arith.constant 1.000000e+00 : f32
    %148 = vector.broadcast %cst_37 : f32 to vector<8x128xf32>
    %149 = arith.addf %148, %147 : vector<8x128xf32>
    %150 = arith.divf %148, %149 : vector<8x128xf32>
    %151 = vector.extract_strided_slice %144 {offsets = [0, 128], sizes = [8, 128], strides = [1, 1]} : vector<8x512xf32> to vector<8x128xf32>
    %152 = arith.negf %151 : vector<8x128xf32>
    %153 = math.exp %152 : vector<8x128xf32>
    %cst_38 = arith.constant 1.000000e+00 : f32
    %154 = vector.broadcast %cst_38 : f32 to vector<8x128xf32>
    %155 = arith.addf %154, %153 : vector<8x128xf32>
    %156 = arith.divf %154, %155 : vector<8x128xf32>
    %157 = vector.extract_strided_slice %144 {offsets = [0, 256], sizes = [8, 128], strides = [1, 1]} : vector<8x512xf32> to vector<8x128xf32>
    %158 = math.tanh %157 : vector<8x128xf32>
    %159 = vector.extract_strided_slice %144 {offsets = [0, 384], sizes = [8, 128], strides = [1, 1]} : vector<8x512xf32> to vector<8x128xf32>
    %160 = arith.negf %159 : vector<8x128xf32>
    %161 = math.exp %160 : vector<8x128xf32>
    %cst_39 = arith.constant 1.000000e+00 : f32
    %162 = vector.broadcast %cst_39 : f32 to vector<8x128xf32>
    %163 = arith.addf %162, %161 : vector<8x128xf32>
    %164 = arith.divf %162, %163 : vector<8x128xf32>
    %165 = arith.mulf %156, %135 : vector<8x128xf32>
    %166 = arith.mulf %150, %158 : vector<8x128xf32>
    %167 = arith.addf %165, %166 : vector<8x128xf32>
    %168 = math.tanh %167 : vector<8x128xf32>
    %169 = arith.mulf %164, %168 : vector<8x128xf32>
    %c5_i32 = arith.constant 5 : i32
    %c8_i32_40 = arith.constant 8 : i32
    %170 = arith.muli %c5_i32, %c8_i32_40 : i32
    %171 = tpu.assume_multiple %170, 8 : i32
    %172 = arith.index_cast %171 : i32 to index
    %c0_41 = arith.constant 0 : index
    %173 = vector.load %arg8[%172, %c0_41] : memref<64x512xf32, #tpu.memory_space<vmem>>, vector<8x512xf32>
    %174 = arith.truncf %169 : vector<8x128xf32> to vector<8x128xbf16>
    %cst_42 = arith.constant dense<0.000000e+00> : vector<8x512xf32>
    %175 = tpu.matmul %174, %7, %cst_42 {dimension_numbers = #tpu.dot_dimension_numbers<[1], [0], [0], [1], [0, 0, 1, 1], [], []>} : vector<8x128xbf16>, vector<128x512xbf16>, vector<8x512xf32> -> vector<8x512xf32>
    %176 = arith.addf %173, %175 : vector<8x512xf32>
    %177 = vector.extract_strided_slice %176 {offsets = [0, 0], sizes = [8, 128], strides = [1, 1]} : vector<8x512xf32> to vector<8x128xf32>
    %178 = arith.negf %177 : vector<8x128xf32>
    %179 = math.exp %178 : vector<8x128xf32>
    %cst_43 = arith.constant 1.000000e+00 : f32
    %180 = vector.broadcast %cst_43 : f32 to vector<8x128xf32>
    %181 = arith.addf %180, %179 : vector<8x128xf32>
    %182 = arith.divf %180, %181 : vector<8x128xf32>
    %183 = vector.extract_strided_slice %176 {offsets = [0, 128], sizes = [8, 128], strides = [1, 1]} : vector<8x512xf32> to vector<8x128xf32>
    %184 = arith.negf %183 : vector<8x128xf32>
    %185 = math.exp %184 : vector<8x128xf32>
    %cst_44 = arith.constant 1.000000e+00 : f32
    %186 = vector.broadcast %cst_44 : f32 to vector<8x128xf32>
    %187 = arith.addf %186, %185 : vector<8x128xf32>
    %188 = arith.divf %186, %187 : vector<8x128xf32>
    %189 = vector.extract_strided_slice %176 {offsets = [0, 256], sizes = [8, 128], strides = [1, 1]} : vector<8x512xf32> to vector<8x128xf32>
    %190 = math.tanh %189 : vector<8x128xf32>
    %191 = vector.extract_strided_slice %176 {offsets = [0, 384], sizes = [8, 128], strides = [1, 1]} : vector<8x512xf32> to vector<8x128xf32>
    %192 = arith.negf %191 : vector<8x128xf32>
    %193 = math.exp %192 : vector<8x128xf32>
    %cst_45 = arith.constant 1.000000e+00 : f32
    %194 = vector.broadcast %cst_45 : f32 to vector<8x128xf32>
    %195 = arith.addf %194, %193 : vector<8x128xf32>
    %196 = arith.divf %194, %195 : vector<8x128xf32>
    %197 = arith.mulf %188, %167 : vector<8x128xf32>
    %198 = arith.mulf %182, %190 : vector<8x128xf32>
    %199 = arith.addf %197, %198 : vector<8x128xf32>
    %200 = math.tanh %199 : vector<8x128xf32>
    %201 = arith.mulf %196, %200 : vector<8x128xf32>
    %c6_i32 = arith.constant 6 : i32
    %c8_i32_46 = arith.constant 8 : i32
    %202 = arith.muli %c6_i32, %c8_i32_46 : i32
    %203 = tpu.assume_multiple %202, 8 : i32
    %204 = arith.index_cast %203 : i32 to index
    %c0_47 = arith.constant 0 : index
    %205 = vector.load %arg8[%204, %c0_47] : memref<64x512xf32, #tpu.memory_space<vmem>>, vector<8x512xf32>
    %206 = arith.truncf %201 : vector<8x128xf32> to vector<8x128xbf16>
    %cst_48 = arith.constant dense<0.000000e+00> : vector<8x512xf32>
    %207 = tpu.matmul %206, %7, %cst_48 {dimension_numbers = #tpu.dot_dimension_numbers<[1], [0], [0], [1], [0, 0, 1, 1], [], []>} : vector<8x128xbf16>, vector<128x512xbf16>, vector<8x512xf32> -> vector<8x512xf32>
    %208 = arith.addf %205, %207 : vector<8x512xf32>
    %209 = vector.extract_strided_slice %208 {offsets = [0, 0], sizes = [8, 128], strides = [1, 1]} : vector<8x512xf32> to vector<8x128xf32>
    %210 = arith.negf %209 : vector<8x128xf32>
    %211 = math.exp %210 : vector<8x128xf32>
    %cst_49 = arith.constant 1.000000e+00 : f32
    %212 = vector.broadcast %cst_49 : f32 to vector<8x128xf32>
    %213 = arith.addf %212, %211 : vector<8x128xf32>
    %214 = arith.divf %212, %213 : vector<8x128xf32>
    %215 = vector.extract_strided_slice %208 {offsets = [0, 128], sizes = [8, 128], strides = [1, 1]} : vector<8x512xf32> to vector<8x128xf32>
    %216 = arith.negf %215 : vector<8x128xf32>
    %217 = math.exp %216 : vector<8x128xf32>
    %cst_50 = arith.constant 1.000000e+00 : f32
    %218 = vector.broadcast %cst_50 : f32 to vector<8x128xf32>
    %219 = arith.addf %218, %217 : vector<8x128xf32>
    %220 = arith.divf %218, %219 : vector<8x128xf32>
    %221 = vector.extract_strided_slice %208 {offsets = [0, 256], sizes = [8, 128], strides = [1, 1]} : vector<8x512xf32> to vector<8x128xf32>
    %222 = math.tanh %221 : vector<8x128xf32>
    %223 = vector.extract_strided_slice %208 {offsets = [0, 384], sizes = [8, 128], strides = [1, 1]} : vector<8x512xf32> to vector<8x128xf32>
    %224 = arith.negf %223 : vector<8x128xf32>
    %225 = math.exp %224 : vector<8x128xf32>
    %cst_51 = arith.constant 1.000000e+00 : f32
    %226 = vector.broadcast %cst_51 : f32 to vector<8x128xf32>
    %227 = arith.addf %226, %225 : vector<8x128xf32>
    %228 = arith.divf %226, %227 : vector<8x128xf32>
    %229 = arith.mulf %220, %199 : vector<8x128xf32>
    %230 = arith.mulf %214, %222 : vector<8x128xf32>
    %231 = arith.addf %229, %230 : vector<8x128xf32>
    %232 = math.tanh %231 : vector<8x128xf32>
    %233 = arith.mulf %228, %232 : vector<8x128xf32>
    %c7_i32 = arith.constant 7 : i32
    %c8_i32_52 = arith.constant 8 : i32
    %234 = arith.muli %c7_i32, %c8_i32_52 : i32
    %235 = tpu.assume_multiple %234, 8 : i32
    %236 = arith.index_cast %235 : i32 to index
    %c0_53 = arith.constant 0 : index
    %237 = vector.load %arg8[%236, %c0_53] : memref<64x512xf32, #tpu.memory_space<vmem>>, vector<8x512xf32>
    %238 = arith.truncf %233 : vector<8x128xf32> to vector<8x128xbf16>
    %cst_54 = arith.constant dense<0.000000e+00> : vector<8x512xf32>
    %239 = tpu.matmul %238, %7, %cst_54 {dimension_numbers = #tpu.dot_dimension_numbers<[1], [0], [0], [1], [0, 0, 1, 1], [], []>} : vector<8x128xbf16>, vector<128x512xbf16>, vector<8x512xf32> -> vector<8x512xf32>
    %240 = arith.addf %237, %239 : vector<8x512xf32>
    %241 = vector.extract_strided_slice %240 {offsets = [0, 0], sizes = [8, 128], strides = [1, 1]} : vector<8x512xf32> to vector<8x128xf32>
    %242 = arith.negf %241 : vector<8x128xf32>
    %243 = math.exp %242 : vector<8x128xf32>
    %cst_55 = arith.constant 1.000000e+00 : f32
    %244 = vector.broadcast %cst_55 : f32 to vector<8x128xf32>
    %245 = arith.addf %244, %243 : vector<8x128xf32>
    %246 = arith.divf %244, %245 : vector<8x128xf32>
    %247 = vector.extract_strided_slice %240 {offsets = [0, 128], sizes = [8, 128], strides = [1, 1]} : vector<8x512xf32> to vector<8x128xf32>
    %248 = arith.negf %247 : vector<8x128xf32>
    %249 = math.exp %248 : vector<8x128xf32>
    %cst_56 = arith.constant 1.000000e+00 : f32
    %250 = vector.broadcast %cst_56 : f32 to vector<8x128xf32>
    %251 = arith.addf %250, %249 : vector<8x128xf32>
    %252 = arith.divf %250, %251 : vector<8x128xf32>
    %253 = vector.extract_strided_slice %240 {offsets = [0, 256], sizes = [8, 128], strides = [1, 1]} : vector<8x512xf32> to vector<8x128xf32>
    %254 = math.tanh %253 : vector<8x128xf32>
    %255 = vector.extract_strided_slice %240 {offsets = [0, 384], sizes = [8, 128], strides = [1, 1]} : vector<8x512xf32> to vector<8x128xf32>
    %256 = arith.negf %255 : vector<8x128xf32>
    %257 = math.exp %256 : vector<8x128xf32>
    %cst_57 = arith.constant 1.000000e+00 : f32
    %258 = vector.broadcast %cst_57 : f32 to vector<8x128xf32>
    %259 = arith.addf %258, %257 : vector<8x128xf32>
    %260 = arith.divf %258, %259 : vector<8x128xf32>
    %261 = arith.mulf %252, %231 : vector<8x128xf32>
    %262 = arith.mulf %246, %254 : vector<8x128xf32>
    %263 = arith.addf %261, %262 : vector<8x128xf32>
    %264 = math.tanh %263 : vector<8x128xf32>
    %265 = arith.mulf %260, %264 : vector<8x128xf32>
    %c8_i32_58 = arith.constant 8 : i32
    %266 = vector.extract_strided_slice %265 {offsets = [0, 0], sizes = [2, 128], strides = [1, 1]} : vector<8x128xf32> to vector<2x128xf32>
    %267 = vector.extract_strided_slice %265 {offsets = [2, 0], sizes = [2, 128], strides = [1, 1]} : vector<8x128xf32> to vector<2x128xf32>
    %268 = arith.truncf %266 : vector<2x128xf32> to vector<2x128xbf16>
    %c0_59 = arith.constant 0 : index
    %c0_60 = arith.constant 0 : index
    %269 = vector.load %arg4[%c0_59, %c0_60] : memref<128x128xbf16, #tpu.memory_space<vmem>>, vector<128x128xbf16>
    %cst_61 = arith.constant dense<0.000000e+00> : vector<2x128xf32>
    %270 = tpu.matmul %268, %269, %cst_61 {dimension_numbers = #tpu.dot_dimension_numbers<[1], [0], [0], [1], [0, 0, 1, 1], [], []>} : vector<2x128xbf16>, vector<128x128xbf16>, vector<2x128xf32> -> vector<2x128xf32>
    %271 = arith.truncf %267 : vector<2x128xf32> to vector<2x128xbf16>
    %c0_62 = arith.constant 0 : index
    %c0_63 = arith.constant 0 : index
    %272 = vector.load %arg5[%c0_62, %c0_63] : memref<128x128xbf16, #tpu.memory_space<vmem>>, vector<128x128xbf16>
    %cst_64 = arith.constant dense<0.000000e+00> : vector<2x128xf32>
    %273 = tpu.matmul %271, %272, %cst_64 {dimension_numbers = #tpu.dot_dimension_numbers<[1], [0], [0], [1], [0, 0, 1, 1], [], []>} : vector<2x128xbf16>, vector<128x128xbf16>, vector<2x128xf32> -> vector<2x128xf32>
    %274 = arith.addf %270, %273 : vector<2x128xf32>
    %c0_65 = arith.constant 0 : index
    %c0_66 = arith.constant 0 : index
    %275 = vector.load %arg6[%c0_65, %c0_66] : memref<1x128xf32, #tpu.memory_space<vmem>>, vector<1x128xf32>
    %276 = vector.broadcast %275 : vector<1x128xf32> to vector<2x128xf32>
    %277 = arith.addf %274, %276 : vector<2x128xf32>
    %c0_67 = arith.constant 0 : index
    %c0_68 = arith.constant 0 : index
    %278 = vector.load %arg7[%c0_67, %c0_68] : memref<2x128xf32, #tpu.memory_space<vmem>>, vector<2x128xf32>
    tpu.vector_store %arg7[%c0_67, %c0_68], %277 {strides = array<i32>} : memref<2x128xf32, #tpu.memory_space<vmem>>, vector<2x128xf32>,
    return
  }
}

</mosaic_0001>

<bundles_post_ra>
// kernel: tpu_custom_call.1
= control target key start
LH: loop header
LB: loop body
LE: loop exit
PB: predicated region body
PF: predicated region fallthrough
CT: control target
= control target key end

     0   :  { %12 = vsyncpa [#allocation4], 0  ;;  %s2910_s0 = inlined_call_operand.vmem [shape: bf16[64,32], index: 0, kind: input, shape index: {}]   ;;  %s2911_s1 = inlined_call_operand.hbm [shape: bf16[32,512], index: 1, kind: input, shape index: {}]   ;;  %s2912_s2 = inlined_call_operand.hbm [shape: bf16[128,512], index: 2, kind: input, shape index: {}]   ;;  %s2913_s3 = inlined_call_operand.vmem [shape: f32[1,512], index: 3, kind: input, shape index: {}]   ;;  %s2914_s4 = inlined_call_operand.hbm [shape: bf16[128,128], index: 4, kind: input, shape index: {}]   ;;  %s2915_s5 = inlined_call_operand.hbm [shape: bf16[128,128], index: 5, kind: input, shape index: {}]   ;;  %s2916_s6 = inlined_call_operand.vmem [shape: f32[1,128], index: 6, kind: input, shape index: {}]   ;;  %s2917_s7 = inlined_call_operand.hbm [shape: f32[2,128], index: 7, kind: output, shape index: {}]  }
   0x1   :  { %13 = vsyncpa [#allocation7], 0 }
   0x2   :  { %14 = vsyncpa [#allocation10], 0 }
   0x3   :  { %15 = vsyncpa [#allocation5], 0  ;;  %s2263_s24 = smov [#allocation6]   ;;  %s2264_s26 = smov [#allocation3]  }
   0x4   :  { %s35_s25 = sshll.u32 %s2263_s24, 4  ;;  %s23_s27 = sshll.u32 %s2264_s26, 4  ;;  %s36_s25 = int_to_ptr.vmem [resolvable:$true] %s35_s25  ;;  %s24_s27 = int_to_ptr.vmem [resolvable:$true] %s23_s27 }
   0x5   :  { %s2163_s28 = scalar_lea.vmem %s36_s25, 4096  ;;  %p2168_p1 = scmp.lt.s32.totalorder %s36_s25, %s36_s25 }
   0x6   :  { %p2164_p0 = scmp.ne.s32.totalorder %s36_s25, %s2163_s28  ;;  %p2169_p2 = scmp.lt.s32.totalorder %s2163_s28, %s2163_s28 }
   0x8   :  { %p2170_p3 = por %p2169_p2, %p2168_p1 }
   0xa   :  { %p2171_p4 = pnand %p2170_p3, %p2164_p0 }
   0xc   :  { %2174 = shalt.err (!%p2171_p4)
}
   0xd   :  { %s2265_s29 = smov 256   ;;  %s2266_s30 = smov 16  }
   0xe   :  { %41 = dma.hbm_to_vmem [thread:$0]  %s2912_s2, 4096, %s36_s25, [#allocation7], %s2265_s29, %s2265_s29, %s2266_s30  }
   0xf   :  { %s2183_s10 = scalar_lea.vmem %s24_s27, 1024  ;;  %p2188_p6 = scmp.lt.s32.totalorder %s24_s27, %s24_s27 }
  0x10   :  { %p2184_p5 = scmp.ne.s32.totalorder %s24_s27, %s2183_s10  ;;  %p2189_p7 = scmp.lt.s32.totalorder %s2183_s10, %s2183_s10 }
  0x12   :  { %p2190_p8 = por %p2189_p7, %p2188_p6 }
  0x14   :  { %p2191_p9 = pnand %p2190_p8, %p2184_p5 }
  0x16   :  { %2194 = shalt.err (!%p2191_p9)
}
  0x17   :  { %29 = dma.hbm_to_vmem [thread:$0]  %s2911_s1, 1024, %s24_s27, [#allocation4], %s2265_s29, %s2265_s29, %s2266_s30  }
  0x18   :  { %s2267_s13 = smov [#allocation8]  }
  0x19   :  { %s49_s14 = sshll.u32 %s2267_s13, 4  ;;  %s50_s14 = int_to_ptr.vmem [resolvable:$true] %s49_s14 }
  0x1a   :  { %s2203_s15 = scalar_lea.vmem %s50_s14, 1024  ;;  %p2208_p11 = scmp.lt.s32.totalorder %s50_s14, %s50_s14 }
  0x1b   :  { %p2204_p10 = scmp.ne.s32.totalorder %s50_s14, %s2203_s15  ;;  %p2209_p12 = scmp.lt.s32.totalorder %s2203_s15, %s2203_s15 }
  0x1d   :  { %p2210_p13 = por %p2209_p12, %p2208_p11 }
  0x1f   :  { %p2211_p0 = pnand %p2210_p13, %p2204_p10 }
  0x21   :  { %2214 = shalt.err (!%p2211_p0)
}
  0x22   :  { %s2268_s2 = smov 64   ;;  %s2269_s16 = smov 4  }
  0x23   :  { %55 = dma.hbm_to_vmem [thread:$0]  %s2914_s4, 1024, %s50_s14, [#allocation7], %s2268_s2, %s2268_s2, %s2269_s16  }
  0x24   :  { %s2270_s19 = smov [#allocation9]  }
  0x25   :  { %s61_s20 = sshll.u32 %s2270_s19, 4  ;;  %s62_s20 = int_to_ptr.vmem [resolvable:$true] %s61_s20 }
  0x26   :  { %s2223_s1 = scalar_lea.vmem %s62_s20, 1024  ;;  %p2228_p2 = scmp.lt.s32.totalorder %s62_s20, %s62_s20 }
  0x27   :  { %p2224_p1 = scmp.ne.s32.totalorder %s62_s20, %s2223_s1  ;;  %p2229_p3 = scmp.lt.s32.totalorder %s2223_s1, %s2223_s1 }
  0x29   :  { %p2230_p4 = por %p2229_p3, %p2228_p2 }
  0x2b   :  { %p2231_p5 = pnand %p2230_p4, %p2224_p1 }
  0x2d   :  { %2234 = shalt.err (!%p2231_p5)
}
  0x2e   :  { %67 = dma.hbm_to_vmem [thread:$0]  %s2915_s5, 1024, %s62_s20, [#allocation10], %s2268_s2, %s2268_s2, %s2269_s16  }
  0x2f   :  { %2255 = dma.done.wait [#allocation4], 1024  }
  0x30   :  { %2256 = vsyncadd [#allocation4], 4294966272 }
  0x31   :  { %2257 = dma.done.wait [#allocation7], 5120  }
  0x32   :  { %2258 = vsyncadd [#allocation7], 4294962176 }
  0x33   :  { %2259 = dma.done.wait [#allocation10], 1024  }
  0x34   :  { %2260 = vsyncadd [#allocation10], 4294966272  ;;  %v2918_v0 = vmov 0   ;;  %v1915_v1 = vld [vmem:[#allocation3 + $0x24] ss:$16 sps:$4 sm:$0xff]   ;;  %vm181_vm0 = vcmask 261120   ;;  %v101_v45 = vlaneseq }
  0x35   :  { %226 = vmatprep.mubr.bf16.mxu0 %v2918_v0  ;;  %299 = vmatprep.mubr.bf16.mxu1 %v2918_v0  ;;  %v1917_v2 = vld [vmem:[#allocation3 + $0x2c] ss:$16 sps:$4 sm:$0xff]   ;;  %v1919_v3 = vld [vmem:[#allocation3 + $0x20] ss:$16 sps:$4 sm:$0xff]   ;;  %v1920_v4 = vld [vmem:[#allocation3 + $0x28] ss:$16 sps:$4 sm:$0xff]  }
  0x36   :  { %206 = vmatprep.subr.bf16.mxu0 %v1915_v1  ;;  %279 = vmatprep.subr.bf16.mxu1 %v1917_v2  ;;  %v1921_v5 = vld [vmem:[#allocation3 + $0x4] ss:$16 sps:$4 sm:$0xff]   ;;  %v1923_v6 = vld [vmem:[#allocation3 + $0xc] ss:$16 sps:$4 sm:$0xff]   ;;  %v1925_v7 = vld [vmem:[#allocation3] ss:$16 sps:$4 sm:$0xff]  }
  0x37   :  { %207 = vmatpush1.bf16.msra.mxu0 %v1919_v3  ;;  %280 = vmatpush1.bf16.msra.mxu1 %v1920_v4  ;;  %v1926_v8 = vld [vmem:[#allocation3 + $0x8] ss:$16 sps:$4 sm:$0xff]   ;;  %v1927_v9 = vld [vmem:[%s2910_s0] sm:$0xff]   ;;  %v2334_v11 = vld [vmem:[#allocation6 + $0xec] ss:$16 sps:$4 sm:$0xff]   ;;  %v102_v46 = vshrl.u32 %v101_v45, 7 }
  0x38   :  { %208 = vmatprep.subr.bf16.mxu0 %v1921_v5  ;;  %281 = vmatprep.subr.bf16.mxu1 %v1923_v6  ;;  %v2332_v10 = vld [vmem:[#allocation6 + $0xe4] ss:$16 sps:$4 sm:$0xff]   ;;  %v2336_v12 = vld [vmem:[#allocation6 + $0xe0] ss:$16 sps:$4 sm:$0xff]   ;;  %v2338_v13 = vld [vmem:[#allocation6 + $0xe8] ss:$16 sps:$4 sm:$0xff]  }
  0x39   :  { %v2341_v14 = vld [vmem:[#allocation6 + $0xc4] ss:$16 sps:$4 sm:$0xff]   ;;  %v2344_v15 = vld [vmem:[#allocation6 + $0xcc] ss:$16 sps:$4 sm:$0xff]   ;;  %v2348_v16 = vld [vmem:[#allocation6 + $0xc0] ss:$16 sps:$4 sm:$0xff]  }
  0x3a   :  { %v2352_v17 = vld [vmem:[#allocation6 + $0xc8] ss:$16 sps:$4 sm:$0xff]   ;;  %v2356_v18 = vld [vmem:[#allocation6 + $0xa4] ss:$16 sps:$4 sm:$0xff]   ;;  %v2363_v20 = vld [vmem:[#allocation6 + $0xac] ss:$16 sps:$4 sm:$0xff]  }
  0x3b   :  { %209 = vmatpush1.bf16.msra.mxu0 %v1925_v7  ;;  %282 = vmatpush1.bf16.msra.mxu1 %v1926_v8  ;;  %v1940_v19 = vld [vmem:[%s2910_s0 + $0x8] sm:$0xff]   ;;  %v2365_v21 = vld [vmem:[#allocation6 + $0xa0] ss:$16 sps:$4 sm:$0xff]   ;;  %v2373_v23 = vld [vmem:[#allocation6 + $0x84] ss:$16 sps:$4 sm:$0xff]   ;;  %v111_v47 = vsub.s32 2, %v102_v46 }
  0x3c   :  { %571 = vmatprep.subr.bf16.mxu0 %v2332_v10  ;;  %612 = vmatprep.subr.bf16.mxu1 %v2334_v11  ;;  %v2369_v22 = vld [vmem:[#allocation6 + $0xa8] ss:$16 sps:$4 sm:$0xff]   ;;  %v2375_v24 = vld [vmem:[#allocation6 + $0x8c] ss:$16 sps:$4 sm:$0xff]   ;;  %v2379_v25 = vld [vmem:[#allocation6 + $0x80] ss:$16 sps:$4 sm:$0xff]  }
  0x3d   :  { %v2383_v26 = vld [vmem:[#allocation6 + $0x88] ss:$16 sps:$4 sm:$0xff]   ;;  %v2387_v27 = vld [vmem:[#allocation6 + $0x64] ss:$16 sps:$4 sm:$0xff]   ;;  %v2389_v28 = vld [vmem:[#allocation6 + $0x6c] ss:$16 sps:$4 sm:$0xff]  }
  0x3e   :  { %1764 = vmatmul.mubr.msk.bf16.vlgmr.msra.gmra.mxu0 %vm181_vm0, %v1927_v9  ;;  %1768 = vmatmul.mubr.msk.bf16.vlgmr.msra.gmra.mxu1 %vm181_vm0, %v1927_v9  ;;  %v1953_v29 = vld [vmem:[%s2910_s0 + $0x10] sm:$0xff]   ;;  %v2398_v31 = vld [vmem:[#allocation6 + $0x68] ss:$16 sps:$4 sm:$0xff]   ;;  %v2406_v33 = vld [vmem:[#allocation6 + $0x4c] ss:$16 sps:$4 sm:$0xff]   ;;  %v103_v48 = vsub.s32 0, %v102_v46 }
  0x3f   :  { %572 = vmatpush1.bf16.msra.mxu0 %v2336_v12  ;;  %613 = vmatpush1.bf16.msra.mxu1 %v2338_v13  ;;  %v2396_v30 = vld [vmem:[#allocation6 + $0x60] ss:$16 sps:$4 sm:$0xff]   ;;  %v2402_v32 = vld [vmem:[#allocation6 + $0x44] ss:$16 sps:$4 sm:$0xff]   ;;  %v2412_v35 = vld [vmem:[#allocation6 + $0x48] ss:$16 sps:$4 sm:$0xff]  }
  0x40   :  { %573 = vmatprep.subr.bf16.mxu0 %v2341_v14  ;;  %614 = vmatprep.subr.bf16.mxu1 %v2344_v15  ;;  %v2410_v34 = vld [vmem:[#allocation6 + $0x40] ss:$16 sps:$4 sm:$0xff]   ;;  %v2416_v36 = vld [vmem:[#allocation6 + $0x24] ss:$16 sps:$4 sm:$0xff]   ;;  %v2420_v37 = vld [vmem:[#allocation6 + $0x2c] ss:$16 sps:$4 sm:$0xff]  }
  0x41   :  { %236 = vmatprep.mubr.bf16.mxu0 %v2918_v0  ;;  %309 = vmatprep.mubr.bf16.mxu1 %v2918_v0  ;;  %v1966_v38 = vld [vmem:[%s2910_s0 + $0x18] sm:$0xff]   ;;  %v2427_v39 = vld [vmem:[#allocation6 + $0x20] ss:$16 sps:$4 sm:$0xff]   ;;  %v2431_v41 = vld [vmem:[#allocation6 + $0x4] ss:$16 sps:$4 sm:$0xff]   ;;  %v115_v49 = vsub.s32 3, %v102_v46 }
  0x42   :  { %v2429_v40 = vld [vmem:[#allocation6 + $0x28] ss:$16 sps:$4 sm:$0xff]   ;;  %v2433_v42 = vld [vmem:[#allocation6 + $0xc] ss:$16 sps:$4 sm:$0xff]   ;;  %v2439_v43 = vld [vmem:[#allocation6] ss:$16 sps:$4 sm:$0xff]  }
  0x43   :  { %574 = vmatpush1.bf16.msra.mxu0 %v2348_v16  ;;  %615 = vmatpush1.bf16.msra.mxu1 %v2352_v17  ;;  %v2441_v44 = vld [vmem:[#allocation6 + $0x8] ss:$16 sps:$4 sm:$0xff]   ;;  %v99_v50 = vld [vmem:[%s2913_s3] sm:$0xf]  ;;  %v107_v54 = vsub.s32 1, %v102_v46  ;;  %vm2273_vm1 = vmmov 0  }
  0x44   :  { %575 = vmatprep.subr.bf16.mxu0 %v2356_v18  ;;  %616 = vmatprep.subr.bf16.mxu1 %v2363_v20  ;;  %v2498_v53 = vrot.slane %v99_v50, %v111_v47  ;;  %v104_v57 = vrot.slane %v99_v50, %v103_v48  ;;  %v2504_v58 = vrot.slane %v99_v50, %v115_v49  ;;  %s2274_s8 = smov [#allocation11]  }
  0x45   :  { %v108_v61 = vrot.slane %v99_v50, %v107_v54  ;;  %s1734_s9 = sshll.u32 %s2274_s8, 4  ;;  %s1735_s9 = int_to_ptr.vmem [resolvable:$true] %s1734_s9 }
  0x46   :  { %1765 = vmatmul.mubr.msk.bf16.gmra.mxu0 %vm181_vm0, %v1940_v19  ;;  %1769 = vmatmul.mubr.msk.bf16.gmra.mxu1 %vm181_vm0, %v1940_v19  ;;  %s2235_s10 = scalar_lea.vmem %s1735_s9, 32  ;;  %p2240_p7 = scmp.lt.s32.totalorder %s1735_s9, %s1735_s9 }
  0x47   :  { %576 = vmatpush1.bf16.msra.mxu0 %v2365_v21  ;;  %617 = vmatpush1.bf16.msra.mxu1 %v2369_v22  ;;  %p2236_p6 = scmp.ne.s32.totalorder %s1735_s9, %s2235_s10  ;;  %p2241_p8 = scmp.lt.s32.totalorder %s2235_s10, %s2235_s10 }
  0x48   :  { %577 = vmatprep.subr.bf16.mxu0 %v2373_v23  ;;  %618 = vmatprep.subr.bf16.mxu1 %v2375_v24 }
  0x49   :  { %246 = vmatprep.mubr.bf16.mxu0 %v2918_v0  ;;  %319 = vmatprep.mubr.bf16.mxu1 %v2918_v0  ;;  %p2242_p9 = por %p2241_p8, %p2240_p7 }
  0x4b   :  { %578 = vmatpush1.bf16.msra.mxu0 %v2379_v25  ;;  %619 = vmatpush1.bf16.msra.mxu1 %v2383_v26  ;;  %p2243_p10 = pnand %p2242_p9, %p2236_p6 }
  0x4c   :  { %579 = vmatprep.subr.bf16.mxu0 %v2387_v27  ;;  %620 = vmatprep.subr.bf16.mxu1 %v2389_v28 }
  0x4e   :  { %1766 = vmatmul.mubr.msk.bf16.gmra.mxu0 %vm181_vm0, %v1953_v29  ;;  %1770 = vmatmul.mubr.msk.bf16.gmra.mxu1 %vm181_vm0, %v1953_v29 }
  0x4f   :  { %580 = vmatpush1.bf16.msra.mxu0 %v2396_v30  ;;  %621 = vmatpush1.bf16.msra.mxu1 %v2398_v31 }
  0x50   :  { %581 = vmatprep.subr.bf16.mxu0 %v2402_v32  ;;  %622 = vmatprep.subr.bf16.mxu1 %v2406_v33 }
  0x51   :  { %256 = vmatprep.mubr.bf16.mxu0 %v2918_v0  ;;  %329 = vmatprep.mubr.bf16.mxu1 %v2918_v0 }
  0x53   :  { %582 = vmatpush1.bf16.msra.mxu0 %v2410_v34  ;;  %623 = vmatpush1.bf16.msra.mxu1 %v2412_v35 }
  0x54   :  { %583 = vmatprep.subr.bf16.mxu0 %v2416_v36  ;;  %624 = vmatprep.subr.bf16.mxu1 %v2420_v37 }
  0x56   :  { %1767 = vmatmul.mubr.msk.bf16.gmra.mxu0 %vm181_vm0, %v1966_v38  ;;  %1771 = vmatmul.mubr.msk.bf16.gmra.mxu1 %vm181_vm0, %v1966_v38 }
  0x57   :  { %584 = vmatpush1.bf16.msra.mxu0 %v2427_v39  ;;  %625 = vmatpush1.bf16.msra.mxu1 %v2429_v40 }
  0x58   :  { %585 = vmatprep.subr.bf16.mxu0 %v2431_v41  ;;  %626 = vmatprep.subr.bf16.mxu1 %v2433_v42 }
  0x59   :  { %603 = vmatprep.mubr.bf16.mxu0 %v2918_v0  ;;  %644 = vmatprep.mubr.bf16.mxu1 %v2918_v0 }
  0x5b   :  { %586 = vmatpush1.bf16.msra.mxu0 %v2439_v43  ;;  %627 = vmatpush1.bf16.msra.mxu1 %v2441_v44 }
  0x5c   :  { %689 = vmatprep.subr.bf16.mxu0 %v2332_v10  ;;  %730 = vmatprep.subr.bf16.mxu1 %v2334_v11 }
  0x5e   :  { %604 = vmatmul.mubr.bf16.vlgmr.msra.gmra.mxu0 %v2918_v0  ;;  %645 = vmatmul.mubr.bf16.vlgmr.msra.gmra.mxu1 %v2918_v0 }
  0x5f   :  { %690 = vmatpush1.bf16.msra.mxu0 %v2336_v12  ;;  %731 = vmatpush1.bf16.msra.mxu1 %v2338_v13 }
  0x60   :  { %691 = vmatprep.subr.bf16.mxu0 %v2341_v14  ;;  %732 = vmatprep.subr.bf16.mxu1 %v2344_v15 }
  0x61   :  { %721 = vmatprep.mubr.bf16.mxu0 %v2918_v0  ;;  %762 = vmatprep.mubr.bf16.mxu1 %v2918_v0 }
  0x63   :  { %692 = vmatpush1.bf16.msra.mxu0 %v2348_v16  ;;  %733 = vmatpush1.bf16.msra.mxu1 %v2352_v17 }
  0x64   :  { %693 = vmatprep.subr.bf16.mxu0 %v2356_v18  ;;  %734 = vmatprep.subr.bf16.mxu1 %v2363_v20 }
  0x67   :  { %694 = vmatpush1.bf16.msra.mxu0 %v2365_v21  ;;  %735 = vmatpush1.bf16.msra.mxu1 %v2369_v22 }
  0x68   :  { %695 = vmatprep.subr.bf16.mxu0 %v2373_v23  ;;  %736 = vmatprep.subr.bf16.mxu1 %v2375_v24 }
  0x6b   :  { %696 = vmatpush1.bf16.msra.mxu0 %v2379_v25  ;;  %737 = vmatpush1.bf16.msra.mxu1 %v2383_v26 }
  0x6c   :  { %697 = vmatprep.subr.bf16.mxu0 %v2387_v27  ;;  %738 = vmatprep.subr.bf16.mxu1 %v2389_v28 }
  0x6f   :  { %698 = vmatpush1.bf16.msra.mxu0 %v2396_v30  ;;  %739 = vmatpush1.bf16.msra.mxu1 %v2398_v31 }
  0x70   :  { %699 = vmatprep.subr.bf16.mxu0 %v2402_v32  ;;  %740 = vmatprep.subr.bf16.mxu1 %v2406_v33 }
  0x73   :  { %700 = vmatpush1.bf16.msra.mxu0 %v2410_v34  ;;  %741 = vmatpush1.bf16.msra.mxu1 %v2412_v35 }
  0x74   :  { %701 = vmatprep.subr.bf16.mxu0 %v2416_v36  ;;  %742 = vmatprep.subr.bf16.mxu1 %v2420_v37 }
  0x77   :  { %702 = vmatpush1.bf16.msra.mxu0 %v2427_v39  ;;  %743 = vmatpush1.bf16.msra.mxu1 %v2429_v40 }
  0x78   :  { %703 = vmatprep.subr.bf16.mxu0 %v2431_v41  ;;  %744 = vmatprep.subr.bf16.mxu1 %v2433_v42 }
  0x7b   :  { %704 = vmatpush1.bf16.msra.mxu0 %v2439_v43  ;;  %745 = vmatpush1.bf16.msra.mxu1 %v2441_v44 }
  0x7c   :  { %807 = vmatprep.subr.bf16.mxu0 %v2332_v10  ;;  %848 = vmatprep.subr.bf16.mxu1 %v2334_v11 }
  0xfe   :  { %v2494_v51 = vpop.f32.mrf.mxu0  ;;  %v2496_v52 = vpop.f32.mrf.mxu1 }
 0x100   :  { %v2500_v55 = vpop.f32.mrf.mxu0  ;;  %v2502_v56 = vpop.f32.mrf.mxu1 }
 0x102   :  { %v232_v59 = vpop.f32.mrf.mxu0  ;;  %v305_v60 = vpop.f32.mrf.mxu1 }
 0x103   :  { %v2506_v62 = vadd.f32 %v232_v59, %v104_v57  ;;  %v2509_v63 = vadd.f32 %v305_v60, %v2498_v53 }
 0x104   :  { %v234_v1 = vpop.f32.mrf.mxu0  ;;  %v307_v2 = vpop.f32.mrf.mxu1 }
 0x105   :  { %v2511_v3 = vadd.f32 %v234_v1, %v108_v61  ;;  %v2514_v4 = vadd.f32 %v307_v2, %v2504_v58 }
 0x106   :  { %v238_v5 = vpop.f32.mrf.mxu0  ;;  %v311_v6 = vpop.f32.mrf.mxu1 }
 0x107   :  { %v2516_v7 = vadd.f32 %v238_v5, %v104_v57  ;;  %v2519_v8 = vadd.f32 %v311_v6, %v2498_v53 }
 0x108   :  { %v240_v9 = vpop.f32.mrf.mxu0  ;;  %v313_v19 = vpop.f32.mrf.mxu1 }
 0x109   :  { %2920 = vst [vmem:[#allocation16_spill] sm:$0xff] %v2519_v8  ;;  %v2521_v29 = vadd.f32 %v240_v9, %v108_v61  ;;  %v2524_v38 = vadd.f32 %v313_v19, %v2504_v58 }
 0x10a   :  { %v242_v45 = vpop.f32.mrf.mxu0  ;;  %v315_v46 = vpop.f32.mrf.mxu1 }
 0x10b   :  { %v2526_v47 = vadd.f32 %v242_v45, %v104_v57  ;;  %v2529_v48 = vadd.f32 %v315_v46, %v2498_v53 }
 0x10c   :  { %v244_v49 = vpop.f32.mrf.mxu0  ;;  %v317_v50 = vpop.f32.mrf.mxu1 }
 0x10d   :  { %2921 = vst [vmem:[#allocation17_spill] sm:$0xff] %v2526_v47  ;;  %2922 = vst [vmem:[#allocation18_spill] sm:$0xff] %v2529_v48  ;;  %v2531_v54 = vadd.f32 %v244_v49, %v108_v61  ;;  %v2534_v59 = vadd.f32 %v317_v50, %v2504_v58 }
 0x10e   :  { %v248_v60 = vpop.f32.mrf.mxu0  ;;  %v321_v1 = vpop.f32.mrf.mxu1 }
 0x10f   :  { %2923 = vst [vmem:[#allocation19_spill] sm:$0xff] %v2531_v54  ;;  %2924 = vst [vmem:[#allocation20_spill] sm:$0xff] %v2534_v59  ;;  %v2536_v2 = vadd.f32 %v248_v60, %v104_v57  ;;  %v2539_v5 = vadd.f32 %v321_v1, %v2498_v53 }
 0x110   :  { %v250_v6 = vpop.f32.mrf.mxu0  ;;  %v323_v9 = vpop.f32.mrf.mxu1 }
 0x111   :  { %2925 = vst [vmem:[#allocation21_spill] sm:$0xff] %v2536_v2  ;;  %2926 = vst [vmem:[#allocation22_spill] sm:$0xff] %v2539_v5  ;;  %v2541_v19 = vadd.f32 %v250_v6, %v108_v61  ;;  %v2544_v45 = vadd.f32 %v323_v9, %v2504_v58 }
 0x112   :  { %v252_v46 = vpop.f32.mrf.mxu0  ;;  %v325_v49 = vpop.f32.mrf.mxu1 }
 0x113   :  { %2927 = vst [vmem:[#allocation23_spill] sm:$0xff] %v2541_v19  ;;  %2928 = vst [vmem:[#allocation24_spill] sm:$0xff] %v2544_v45  ;;  %v2546_v0 = vadd.f32 %v252_v46, %v104_v57  ;;  %v2549_v50 = vadd.f32 %v325_v49, %v2498_v53 }
 0x114   :  { %v254_v48 = vpop.f32.mrf.mxu0  ;;  %v327_v60 = vpop.f32.mrf.mxu1 }
 0x115   :  { %2929 = vst [vmem:[#allocation25_spill] sm:$0xff] %v2546_v0  ;;  %2930 = vst [vmem:[#allocation26_spill] sm:$0xff] %v2549_v50  ;;  %v2551_v2 = vadd.f32 %v254_v48, %v108_v61  ;;  %v2554_v1 = vadd.f32 %v327_v60, %v2504_v58 }
 0x116   :  { %v258_v5 = vpop.f32.mrf.mxu0  ;;  %v331_v6 = vpop.f32.mrf.mxu1 }
 0x117   :  { %2931 = vst [vmem:[#allocation27_spill] sm:$0xff] %v2551_v2  ;;  %2932 = vst [vmem:[#allocation28_spill] sm:$0xff] %v2554_v1  ;;  %v2556_v19 = vadd.f32 %v258_v5, %v104_v57  ;;  %v2559_v9 = vadd.f32 %v331_v6, %v2498_v53 }
 0x118   :  { %v260_v45 = vpop.f32.mrf.mxu0  ;;  %v333_v46 = vpop.f32.mrf.mxu1 }
 0x119   :  { %2933 = vst [vmem:[#allocation29_spill] sm:$0xff] %v2556_v19  ;;  %2934 = vst [vmem:[#allocation30_spill] sm:$0xff] %v2559_v9  ;;  %v2561_v0 = vadd.f32 %v260_v45, %v108_v61  ;;  %v2564_v49 = vadd.f32 %v333_v46, %v2504_v58  ;;  %v229_v19 = vadd.f32 %v2494_v51, %v104_v57 }
 0x11a   :  { %v262_v50 = vpop.f32.mrf.mxu0  ;;  %v335_v48 = vpop.f32.mrf.mxu1  ;;  %v231_v46 = vadd.f32 %v2500_v55, %v108_v61 }
 0x11b   :  { %2935 = vst [vmem:[#allocation31_spill] sm:$0xff] %v2561_v0  ;;  %2936 = vst [vmem:[#allocation32_spill] sm:$0xff] %v2564_v49  ;;  %v2566_v2 = vadd.f32 %v262_v50, %v104_v57  ;;  %v2569_v60 = vadd.f32 %v335_v48, %v2498_v53  ;;  %v304_v57 = vadd.f32 %v2502_v56, %v2504_v58 }
 0x11c   :  { %v264_v1 = vpop.f32.mrf.mxu0  ;;  %v337_v5 = vpop.f32.mrf.mxu1 }
 0x11d   :  { %2937 = vst [vmem:[#allocation33_spill] sm:$0xff] %v2566_v2  ;;  %2938 = vst [vmem:[#allocation34_spill] sm:$0xff] %v2569_v60  ;;  %v2572_v6 = vadd.f32 %v264_v1, %v108_v61  ;;  %v2575_v9 = vadd.f32 %v337_v5, %v2504_v58  ;;  %v302_v5 = vadd.f32 %v2496_v52, %v2498_v53 }
 0x11e   :  { %v605_v45 = vpop.f32.mrf.mxu0  ;;  %v646_v0 = vpop.f32.mrf.mxu1 }
 0x11f   :  { %v653_v49 = vadd.f32 %v605_v45, %v229_v19  ;;  %v655_v19 = vadd.f32 %v646_v0, %v302_v5 }
 0x120   :  { %v607_v59 = vpop.f32.mrf.mxu0  ;;  %v648_v50 = vpop.f32.mrf.mxu1 }
 0x121   :  { %v1804_v2 = vmul.f32 -1.442695, %v653_v49  ;;  %v654_v54 = vadd.f32 %v607_v59, %v231_v46  ;;  %v656_v1 = vadd.f32 %v648_v50, %v304_v57 }
 0x122   :  { %v609_v48 = vpop.f32.mrf.mxu0  ;;  %v650_v60 = vpop.f32.mrf.mxu1 }
 0x123   :  { %1995 = vpow2.f32 %v1804_v2  ;;  %v1805_v47 = vmul.f32 -1.442695, %v654_v54  ;;  %v1806_v55 = vmul.f32 -1.442695, %v656_v1  ;;  %v2939_v48 = vmov 0  }
 0x124   :  { %v610_v8 = vpop.f32.mrf.mxu0  ;;  %v651_v51 = vpop.f32.mrf.mxu1 }
 0x125   :  { %1997 = vpow2.f32 %v1805_v47 }
 0x126   :  { %1999 = vpow2.f32 %v1806_v55 }
 0x130   :  { %v1996_v61 = vpop.eup %1995 }
 0x131   :  { %v660_v45 = vadd.f32 1.0, %v1996_v61 }
 0x132   :  { %v1998_v49 = vpop.eup %1997 }
 0x133   :  { %2001 = vrcp.f32 %v660_v45  ;;  %v666_v59 = vadd.f32 1.0, %v1998_v49  ;;  %v2000_v8 = vpop.eup %1999 }
 0x134   :  { %2003 = vtanh.f32 %v655_v19  ;;  %v673_v60 = vadd.f32 1.0, %v2000_v8 }
 0x135   :  { %2005 = vrcp.f32 %v666_v59 }
 0x136   :  { %2007 = vrcp.f32 %v673_v60 }
 0x140   :  { %v2002_v54 = vpop.eup %2001 }
 0x141   :  { %v2004_v47 = vpop.eup %2003 }
 0x142   :  { %v2006_v2 = vpop.eup %2005  ;;  %v677_v58 = vmul.f32 %v2004_v47, %v2002_v54 }
 0x143   :  { %v676_v56 = vmul.f32 0.0, %v2006_v2  ;;  %v2008_v0 = vpop.eup %2007 }
 0x145   :  { %v2582_v46 = vadd.f32 %v677_v58, %v676_v56 }
 0x147   :  { %2009 = vtanh.f32 %v2582_v46 }
 0x154   :  { %v2010_v52 = vpop.eup %2009 }
 0x155   :  { %v680_v53 = vmul.f32 %v2010_v52, %v2008_v0 }
 0x157   :  { %v688_v50 = vpack.c.bf16 %v680_v53, %v680_v53 }
 0x159   :  { %722 = vmatmul.mubr.bf16.vlgmr.msra.gmra.mxu0 %v688_v50  ;;  %763 = vmatmul.mubr.bf16.vlgmr.msra.gmra.mxu1 %v688_v50 }
 0x15a   :  { %808 = vmatpush1.bf16.msra.mxu0 %v2336_v12  ;;  %849 = vmatpush1.bf16.msra.mxu1 %v2338_v13 }
 0x15b   :  { %809 = vmatprep.subr.bf16.mxu0 %v2341_v14  ;;  %850 = vmatprep.subr.bf16.mxu1 %v2344_v15 }
 0x15c   :  { %839 = vmatprep.mubr.bf16.mxu0 %v2939_v48  ;;  %880 = vmatprep.mubr.bf16.mxu1 %v2939_v48 }
 0x15e   :  { %810 = vmatpush1.bf16.msra.mxu0 %v2348_v16  ;;  %851 = vmatpush1.bf16.msra.mxu1 %v2352_v17 }
 0x15f   :  { %811 = vmatprep.subr.bf16.mxu0 %v2356_v18  ;;  %852 = vmatprep.subr.bf16.mxu1 %v2363_v20 }
 0x162   :  { %812 = vmatpush1.bf16.msra.mxu0 %v2365_v21  ;;  %853 = vmatpush1.bf16.msra.mxu1 %v2369_v22 }
 0x163   :  { %813 = vmatprep.subr.bf16.mxu0 %v2373_v23  ;;  %854 = vmatprep.subr.bf16.mxu1 %v2375_v24 }
 0x166   :  { %814 = vmatpush1.bf16.msra.mxu0 %v2379_v25  ;;  %855 = vmatpush1.bf16.msra.mxu1 %v2383_v26 }
 0x167   :  { %815 = vmatprep.subr.bf16.mxu0 %v2387_v27  ;;  %856 = vmatprep.subr.bf16.mxu1 %v2389_v28 }
 0x16a   :  { %816 = vmatpush1.bf16.msra.mxu0 %v2396_v30  ;;  %857 = vmatpush1.bf16.msra.mxu1 %v2398_v31 }
 0x16b   :  { %817 = vmatprep.subr.bf16.mxu0 %v2402_v32  ;;  %858 = vmatprep.subr.bf16.mxu1 %v2406_v33 }
 0x16e   :  { %818 = vmatpush1.bf16.msra.mxu0 %v2410_v34  ;;  %859 = vmatpush1.bf16.msra.mxu1 %v2412_v35 }
 0x16f   :  { %819 = vmatprep.subr.bf16.mxu0 %v2416_v36  ;;  %860 = vmatprep.subr.bf16.mxu1 %v2420_v37 }
 0x172   :  { %820 = vmatpush1.bf16.msra.mxu0 %v2427_v39  ;;  %861 = vmatpush1.bf16.msra.mxu1 %v2429_v40 }
 0x173   :  { %821 = vmatprep.subr.bf16.mxu0 %v2431_v41  ;;  %862 = vmatprep.subr.bf16.mxu1 %v2433_v42 }
 0x176   :  { %822 = vmatpush1.bf16.msra.mxu0 %v2439_v43  ;;  %863 = vmatpush1.bf16.msra.mxu1 %v2441_v44 }
 0x177   :  { %925 = vmatprep.subr.bf16.mxu0 %v2332_v10  ;;  %966 = vmatprep.subr.bf16.mxu1 %v2334_v11 }
 0x219   :  { %v723_v51 = vpop.f32.mrf.mxu0  ;;  %v764_v57 = vpop.f32.mrf.mxu1 }
 0x21a   :  { %v771_v1 = vadd.f32 %v723_v51, %v2506_v62  ;;  %v773_v2 = vadd.f32 %v764_v57, %v2509_v63 }
 0x21b   :  { %v725_v5 = vpop.f32.mrf.mxu0  ;;  %v766_v55 = vpop.f32.mrf.mxu1 }
 0x21c   :  { %v1807_v61 = vmul.f32 -1.442695, %v771_v1  ;;  %v772_v19 = vadd.f32 %v725_v5, %v2511_v3  ;;  %v774_v47 = vadd.f32 %v766_v55, %v2514_v4 }
 0x21d   :  { %v727_v45 = vpop.f32.mrf.mxu0  ;;  %v768_v49 = vpop.f32.mrf.mxu1 }
 0x21e   :  { %2011 = vpow2.f32 %v1807_v61  ;;  %v1808_v59 = vmul.f32 -1.442695, %v772_v19  ;;  %v1809_v60 = vmul.f32 -1.442695, %v774_v47 }
 0x21f   :  { %v728_v8 = vpop.f32.mrf.mxu0  ;;  %v769_v54 = vpop.f32.mrf.mxu1 }
 0x220   :  { %2013 = vpow2.f32 %v1808_v59 }
 0x221   :  { %2015 = vtanh.f32 %v773_v2 }
 0x222   :  { %2017 = vpow2.f32 %v1809_v60 }
 0x22b   :  { %v2012_v56 = vpop.eup %2011 }
 0x22c   :  { %v778_v58 = vadd.f32 1.0, %v2012_v56 }
 0x22d   :  { %v2014_v62 = vpop.eup %2013 }
 0x22e   :  { %2019 = vrcp.f32 %v778_v58  ;;  %v784_v0 = vadd.f32 1.0, %v2014_v62  ;;  %v2016_v3 = vpop.eup %2015 }
 0x22f   :  { %v2018_v52 = vpop.eup %2017 }
 0x230   :  { %2021 = vrcp.f32 %v784_v0  ;;  %v791_v1 = vadd.f32 1.0, %v2018_v52  ;;  %v2940_v0 = vld [vmem:[#allocation16_spill] sm:$0xff] }
 0x232   :  { %2023 = vrcp.f32 %v791_v1 }
 0x23b   :  { %v2020_v53 = vpop.eup %2019 }
 0x23c   :  { %v795_v50 = vmul.f32 %v2020_v53, %v2016_v3 }
 0x23d   :  { %v2022_v51 = vpop.eup %2021 }
 0x23e   :  { %v794_v5 = vmul.f32 %v2022_v51, %v2582_v46 }
 0x23f   :  { %v2024_v63 = vpop.eup %2023 }
 0x240   :  { %v2624_v4 = vadd.f32 %v795_v50, %v794_v5 }
 0x242   :  { %2025 = vtanh.f32 %v2624_v4 }
 0x24f   :  { %v2026_v57 = vpop.eup %2025 }
 0x250   :  { %v798_v55 = vmul.f32 %v2026_v57, %v2024_v63 }
 0x252   :  { %v806_v61 = vpack.c.bf16 %v798_v55, %v798_v55 }
 0x254   :  { %840 = vmatmul.mubr.bf16.vlgmr.msra.gmra.mxu0 %v806_v61  ;;  %881 = vmatmul.mubr.bf16.vlgmr.msra.gmra.mxu1 %v806_v61 }
 0x255   :  { %926 = vmatpush1.bf16.msra.mxu0 %v2336_v12  ;;  %967 = vmatpush1.bf16.msra.mxu1 %v2338_v13 }
 0x256   :  { %927 = vmatprep.subr.bf16.mxu0 %v2341_v14  ;;  %968 = vmatprep.subr.bf16.mxu1 %v2344_v15 }
 0x257   :  { %957 = vmatprep.mubr.bf16.mxu0 %v2939_v48  ;;  %998 = vmatprep.mubr.bf16.mxu1 %v2939_v48 }
 0x259   :  { %928 = vmatpush1.bf16.msra.mxu0 %v2348_v16  ;;  %969 = vmatpush1.bf16.msra.mxu1 %v2352_v17 }
 0x25a   :  { %929 = vmatprep.subr.bf16.mxu0 %v2356_v18  ;;  %970 = vmatprep.subr.bf16.mxu1 %v2363_v20 }
 0x25d   :  { %930 = vmatpush1.bf16.msra.mxu0 %v2365_v21  ;;  %971 = vmatpush1.bf16.msra.mxu1 %v2369_v22 }
 0x25e   :  { %931 = vmatprep.subr.bf16.mxu0 %v2373_v23  ;;  %972 = vmatprep.subr.bf16.mxu1 %v2375_v24 }
 0x261   :  { %932 = vmatpush1.bf16.msra.mxu0 %v2379_v25  ;;  %973 = vmatpush1.bf16.msra.mxu1 %v2383_v26 }
 0x262   :  { %933 = vmatprep.subr.bf16.mxu0 %v2387_v27  ;;  %974 = vmatprep.subr.bf16.mxu1 %v2389_v28 }
 0x265   :  { %934 = vmatpush1.bf16.msra.mxu0 %v2396_v30  ;;  %975 = vmatpush1.bf16.msra.mxu1 %v2398_v31 }
 0x266   :  { %935 = vmatprep.subr.bf16.mxu0 %v2402_v32  ;;  %976 = vmatprep.subr.bf16.mxu1 %v2406_v33 }
 0x269   :  { %936 = vmatpush1.bf16.msra.mxu0 %v2410_v34  ;;  %977 = vmatpush1.bf16.msra.mxu1 %v2412_v35 }
 0x26a   :  { %937 = vmatprep.subr.bf16.mxu0 %v2416_v36  ;;  %978 = vmatprep.subr.bf16.mxu1 %v2420_v37 }
 0x26d   :  { %938 = vmatpush1.bf16.msra.mxu0 %v2427_v39  ;;  %979 = vmatpush1.bf16.msra.mxu1 %v2429_v40 }
 0x26e   :  { %939 = vmatprep.subr.bf16.mxu0 %v2431_v41  ;;  %980 = vmatprep.subr.bf16.mxu1 %v2433_v42 }
 0x271   :  { %940 = vmatpush1.bf16.msra.mxu0 %v2439_v43  ;;  %981 = vmatpush1.bf16.msra.mxu1 %v2441_v44 }
 0x272   :  { %1043 = vmatprep.subr.bf16.mxu0 %v2332_v10  ;;  %1084 = vmatprep.subr.bf16.mxu1 %v2334_v11 }
 0x314   :  { %v841_v46 = vpop.f32.mrf.mxu0  ;;  %v882_v19 = vpop.f32.mrf.mxu1 }
 0x315   :  { %v889_v45 = vadd.f32 %v841_v46, %v2516_v7  ;;  %v891_v3 = vadd.f32 %v882_v19, %v2940_v0 }
 0x316   :  { %v843_v49 = vpop.f32.mrf.mxu0  ;;  %v884_v59 = vpop.f32.mrf.mxu1 }
 0x317   :  { %v1810_v8 = vmul.f32 -1.442695, %v889_v45  ;;  %v890_v54 = vadd.f32 %v843_v49, %v2521_v29  ;;  %v892_v62 = vadd.f32 %v884_v59, %v2524_v38 }
 0x318   :  { %v845_v47 = vpop.f32.mrf.mxu0  ;;  %v886_v2 = vpop.f32.mrf.mxu1 }
 0x319   :  { %2027 = vpow2.f32 %v1810_v8  ;;  %v1811_v60 = vmul.f32 -1.442695, %v890_v54  ;;  %v1812_v52 = vmul.f32 -1.442695, %v892_v62 }
 0x31a   :  { %v846_v56 = vpop.f32.mrf.mxu0  ;;  %v887_v58 = vpop.f32.mrf.mxu1 }
 0x31b   :  { %2029 = vpow2.f32 %v1811_v60  ;;  %v2943_v56 = vld [vmem:[#allocation20_spill] sm:$0xff]  ;;  %v2944_v58 = vld [vmem:[#allocation18_spill] sm:$0xff] }
 0x31c   :  { %2031 = vtanh.f32 %v891_v3 }
 0x31d   :  { %2033 = vpow2.f32 %v1812_v52 }
 0x326   :  { %v2028_v53 = vpop.eup %2027 }
 0x327   :  { %v896_v50 = vadd.f32 1.0, %v2028_v53 }
 0x328   :  { %v2030_v7 = vpop.eup %2029 }
 0x329   :  { %2035 = vrcp.f32 %v896_v50  ;;  %v902_v51 = vadd.f32 1.0, %v2030_v7  ;;  %v2032_v29 = vpop.eup %2031 }
 0x32a   :  { %v2034_v1 = vpop.eup %2033 }
 0x32b   :  { %2037 = vrcp.f32 %v902_v51  ;;  %v909_v55 = vadd.f32 1.0, %v2034_v1 }
 0x32d   :  { %2039 = vrcp.f32 %v909_v55 }
 0x336   :  { %v2036_v5 = vpop.eup %2035 }
 0x337   :  { %v913_v63 = vmul.f32 %v2036_v5, %v2032_v29 }
 0x338   :  { %v2038_v57 = vpop.eup %2037 }
 0x339   :  { %v912_v61 = vmul.f32 %v2038_v57, %v2624_v4  ;;  %v2942_v4 = vld [vmem:[#allocation19_spill] sm:$0xff] }
 0x33a   :  { %v2040_v46 = vpop.eup %2039 }
 0x33b   :  { %v2666_v38 = vadd.f32 %v913_v63, %v912_v61 }
 0x33d   :  { %2041 = vtanh.f32 %v2666_v38 }
 0x34a   :  { %v2042_v19 = vpop.eup %2041 }
 0x34b   :  { %v916_v45 = vmul.f32 %v2042_v19, %v2040_v46 }
 0x34d   :  { %v924_v49 = vpack.c.bf16 %v916_v45, %v916_v45  ;;  %v2711_v45 = vld [vmem:[#allocation6 + $0xe0] ss:$16 sps:$4 sm:$0xff]  }
 0x34f   :  { %958 = vmatmul.mubr.bf16.vlgmr.msra.gmra.mxu0 %v924_v49  ;;  %999 = vmatmul.mubr.bf16.vlgmr.msra.gmra.mxu1 %v924_v49  ;;  %v2714_v49 = vld [vmem:[#allocation6 + $0xe8] ss:$16 sps:$4 sm:$0xff]  }
 0x350   :  { %1044 = vmatpush1.bf16.msra.mxu0 %v2336_v12  ;;  %1085 = vmatpush1.bf16.msra.mxu1 %v2338_v13 }
 0x351   :  { %1045 = vmatprep.subr.bf16.mxu0 %v2341_v14  ;;  %1086 = vmatprep.subr.bf16.mxu1 %v2344_v15  ;;  %v2941_v14 = vld [vmem:[#allocation17_spill] sm:$0xff] }
 0x352   :  { %1075 = vmatprep.mubr.bf16.mxu0 %v2939_v48  ;;  %1116 = vmatprep.mubr.bf16.mxu1 %v2939_v48 }
 0x354   :  { %1046 = vmatpush1.bf16.msra.mxu0 %v2348_v16  ;;  %1087 = vmatpush1.bf16.msra.mxu1 %v2352_v17 }
 0x355   :  { %1047 = vmatprep.subr.bf16.mxu0 %v2356_v18  ;;  %1088 = vmatprep.subr.bf16.mxu1 %v2363_v20 }
 0x358   :  { %1048 = vmatpush1.bf16.msra.mxu0 %v2365_v21  ;;  %1089 = vmatpush1.bf16.msra.mxu1 %v2369_v22 }
 0x359   :  { %1049 = vmatprep.subr.bf16.mxu0 %v2373_v23  ;;  %1090 = vmatprep.subr.bf16.mxu1 %v2375_v24 }
 0x35c   :  { %1050 = vmatpush1.bf16.msra.mxu0 %v2379_v25  ;;  %1091 = vmatpush1.bf16.msra.mxu1 %v2383_v26 }
 0x35d   :  { %1051 = vmatprep.subr.bf16.mxu0 %v2387_v27  ;;  %1092 = vmatprep.subr.bf16.mxu1 %v2389_v28 }
 0x360   :  { %1052 = vmatpush1.bf16.msra.mxu0 %v2396_v30  ;;  %1093 = vmatpush1.bf16.msra.mxu1 %v2398_v31 }
 0x361   :  { %1053 = vmatprep.subr.bf16.mxu0 %v2402_v32  ;;  %1094 = vmatprep.subr.bf16.mxu1 %v2406_v33 }
 0x364   :  { %1054 = vmatpush1.bf16.msra.mxu0 %v2410_v34  ;;  %1095 = vmatpush1.bf16.msra.mxu1 %v2412_v35 }
 0x365   :  { %1055 = vmatprep.subr.bf16.mxu0 %v2416_v36  ;;  %1096 = vmatprep.subr.bf16.mxu1 %v2420_v37 }
 0x368   :  { %1056 = vmatpush1.bf16.msra.mxu0 %v2427_v39  ;;  %1097 = vmatpush1.bf16.msra.mxu1 %v2429_v40 }
 0x369   :  { %1057 = vmatprep.subr.bf16.mxu0 %v2431_v41  ;;  %1098 = vmatprep.subr.bf16.mxu1 %v2433_v42 }
 0x36c   :  { %1058 = vmatpush1.bf16.msra.mxu0 %v2439_v43  ;;  %1099 = vmatpush1.bf16.msra.mxu1 %v2441_v44 }
 0x36d   :  { %1161 = vmatprep.subr.bf16.mxu0 %v2332_v10  ;;  %1202 = vmatprep.subr.bf16.mxu1 %v2334_v11 }
 0x40f   :  { %v959_v12 = vpop.f32.mrf.mxu0  ;;  %v1000_v13 = vpop.f32.mrf.mxu1 }
 0x410   :  { %v1007_v15 = vadd.f32 %v959_v12, %v2941_v14  ;;  %v1009_v11 = vadd.f32 %v1000_v13, %v2944_v58  ;;  %v2720_v12 = vld [vmem:[#allocation6 + $0xcc] ss:$16 sps:$4 sm:$0xff]   ;;  %v2725_v13 = vld [vmem:[#allocation6 + $0xc0] ss:$16 sps:$4 sm:$0xff]   ;;  %v2728_v14 = vld [vmem:[#allocation6 + $0xc8] ss:$16 sps:$4 sm:$0xff]  }
 0x411   :  { %v961_v16 = vpop.f32.mrf.mxu0  ;;  %v1002_v17 = vpop.f32.mrf.mxu1 }
 0x412   :  { %v1813_v18 = vmul.f32 -1.442695, %v1007_v15  ;;  %v1008_v59 = vadd.f32 %v961_v16, %v2942_v4  ;;  %v1010_v10 = vadd.f32 %v1002_v17, %v2943_v56  ;;  %v2731_v15 = vld [vmem:[#allocation6 + $0xa4] ss:$16 sps:$4 sm:$0xff]  }
 0x413   :  { %v963_v8 = vpop.f32.mrf.mxu0  ;;  %v1004_v54 = vpop.f32.mrf.mxu1 }
 0x414   :  { %2043 = vpow2.f32 %v1813_v18  ;;  %v1814_v47 = vmul.f32 -1.442695, %v1008_v59  ;;  %v1815_v62 = vmul.f32 -1.442695, %v1010_v10 }
 0x415   :  { %v964_v2 = vpop.f32.mrf.mxu0  ;;  %v1005_v60 = vpop.f32.mrf.mxu1 }
 0x416   :  { %2045 = vpow2.f32 %v1814_v47 }
 0x417   :  { %2047 = vtanh.f32 %v1009_v11 }
 0x418   :  { %2049 = vpow2.f32 %v1815_v62  ;;  %v2780_v62 = vld [vmem:[#allocation6 + $0xac] ss:$16 sps:$4 sm:$0xff]  }
 0x421   :  { %v2044_v0 = vpop.eup %2043 }
 0x422   :  { %v1014_v3 = vadd.f32 1.0, %v2044_v0  ;;  %v2783_v0 = vld [vmem:[#allocation6 + $0xa0] ss:$16 sps:$4 sm:$0xff]  }
 0x423   :  { %v2046_v52 = vpop.eup %2045 }
 0x424   :  { %2051 = vrcp.f32 %v1014_v3  ;;  %v1020_v53 = vadd.f32 1.0, %v2046_v52  ;;  %v2048_v50 = vpop.eup %2047  ;;  %v2786_v3 = vld [vmem:[#allocation6 + $0xa8] ss:$16 sps:$4 sm:$0xff]   ;;  %v2789_v52 = vld [vmem:[#allocation6 + $0x84] ss:$16 sps:$4 sm:$0xff]  }
 0x425   :  { %v2050_v7 = vpop.eup %2049 }
 0x426   :  { %2053 = vrcp.f32 %v1020_v53  ;;  %v1027_v5 = vadd.f32 1.0, %v2050_v7  ;;  %v2792_v53 = vld [vmem:[#allocation6 + $0x8c] ss:$16 sps:$4 sm:$0xff]   ;;  %v2798_v7 = vld [vmem:[#allocation6 + $0x88] ss:$16 sps:$4 sm:$0xff]  }
 0x428   :  { %2055 = vrcp.f32 %v1027_v5  ;;  %v2810_v5 = vld [vmem:[#allocation6 + $0x68] ss:$16 sps:$4 sm:$0xff]  }
 0x431   :  { %v2052_v51 = vpop.eup %2051 }
 0x432   :  { %v1031_v29 = vmul.f32 %v2052_v51, %v2048_v50  ;;  %v2795_v50 = vld [vmem:[#allocation6 + $0x80] ss:$16 sps:$4 sm:$0xff]   ;;  %v2801_v51 = vld [vmem:[#allocation6 + $0x64] ss:$16 sps:$4 sm:$0xff]  }
 0x433   :  { %v2054_v1 = vpop.eup %2053 }
 0x434   :  { %v1030_v63 = vmul.f32 %v2054_v1, %v2666_v38  ;;  %v2717_v38 = vld [vmem:[#allocation6 + $0xc4] ss:$16 sps:$4 sm:$0xff]   ;;  %v2807_v1 = vld [vmem:[#allocation6 + $0x60] ss:$16 sps:$4 sm:$0xff]  }
 0x435   :  { %v2056_v55 = vpop.eup %2055 }
 0x436   :  { %v2708_v57 = vadd.f32 %v1031_v29, %v1030_v63  ;;  %v2804_v29 = vld [vmem:[#allocation6 + $0x6c] ss:$16 sps:$4 sm:$0xff]   ;;  %v2813_v63 = vld [vmem:[#allocation6 + $0x44] ss:$16 sps:$4 sm:$0xff]  }
 0x438   :  { %2057 = vtanh.f32 %v2708_v57 }
 0x445   :  { %v2058_v61 = vpop.eup %2057 }
 0x446   :  { %v1034_v46 = vmul.f32 %v2058_v61, %v2056_v55  ;;  %v2819_v55 = vld [vmem:[#allocation6 + $0x40] ss:$16 sps:$4 sm:$0xff]   ;;  %v2822_v61 = vld [vmem:[#allocation6 + $0x48] ss:$16 sps:$4 sm:$0xff]  }
 0x448   :  { %v1042_v19 = vpack.c.bf16 %v1034_v46, %v1034_v46  ;;  %v2825_v46 = vld [vmem:[#allocation6 + $0x24] ss:$16 sps:$4 sm:$0xff]  }
 0x44a   :  { %1076 = vmatmul.mubr.bf16.vlgmr.msra.gmra.mxu0 %v1042_v19  ;;  %1117 = vmatmul.mubr.bf16.vlgmr.msra.gmra.mxu1 %v1042_v19  ;;  %v2828_v19 = vld [vmem:[#allocation6 + $0x2c] ss:$16 sps:$4 sm:$0xff]  }
 0x44b   :  { %1162 = vmatpush1.bf16.msra.mxu0 %v2711_v45  ;;  %1203 = vmatpush1.bf16.msra.mxu1 %v2714_v49 }
 0x44c   :  { %1163 = vmatprep.subr.bf16.mxu0 %v2717_v38  ;;  %1204 = vmatprep.subr.bf16.mxu1 %v2720_v12 }
 0x44d   :  { %1193 = vmatprep.mubr.bf16.mxu0 %v2939_v48  ;;  %1234 = vmatprep.mubr.bf16.mxu1 %v2939_v48 }
 0x44f   :  { %1164 = vmatpush1.bf16.msra.mxu0 %v2725_v13  ;;  %1205 = vmatpush1.bf16.msra.mxu1 %v2728_v14 }
 0x450   :  { %1165 = vmatprep.subr.bf16.mxu0 %v2731_v15  ;;  %1206 = vmatprep.subr.bf16.mxu1 %v2363_v20  ;;  %v2757_v20 = vld [vmem:[#allocation6 + $0xe4] ss:$16 sps:$4 sm:$0xff]  }
 0x453   :  { %1166 = vmatpush1.bf16.msra.mxu0 %v2365_v21  ;;  %1207 = vmatpush1.bf16.msra.mxu1 %v2369_v22  ;;  %v2760_v21 = vld [vmem:[#allocation6 + $0xec] ss:$16 sps:$4 sm:$0xff]  }
 0x454   :  { %1167 = vmatprep.subr.bf16.mxu0 %v2373_v23  ;;  %1208 = vmatprep.subr.bf16.mxu1 %v2375_v24  ;;  %v2945_v24 = vld [vmem:[#allocation21_spill] sm:$0xff] }
 0x457   :  { %1168 = vmatpush1.bf16.msra.mxu0 %v2379_v25  ;;  %1209 = vmatpush1.bf16.msra.mxu1 %v2383_v26 }
 0x458   :  { %1169 = vmatprep.subr.bf16.mxu0 %v2387_v27  ;;  %1210 = vmatprep.subr.bf16.mxu1 %v2389_v28 }
 0x45b   :  { %1170 = vmatpush1.bf16.msra.mxu0 %v2396_v30  ;;  %1211 = vmatpush1.bf16.msra.mxu1 %v2398_v31  ;;  %v2946_v30 = vld [vmem:[#allocation23_spill] sm:$0xff] }
 0x45c   :  { %1171 = vmatprep.subr.bf16.mxu0 %v2402_v32  ;;  %1212 = vmatprep.subr.bf16.mxu1 %v2406_v33 }
 0x45f   :  { %1172 = vmatpush1.bf16.msra.mxu0 %v2410_v34  ;;  %1213 = vmatpush1.bf16.msra.mxu1 %v2412_v35 }
 0x460   :  { %1173 = vmatprep.subr.bf16.mxu0 %v2416_v36  ;;  %1214 = vmatprep.subr.bf16.mxu1 %v2420_v37  ;;  %v2947_v37 = vld [vmem:[#allocation24_spill] sm:$0xff] }
 0x463   :  { %1174 = vmatpush1.bf16.msra.mxu0 %v2427_v39  ;;  %1215 = vmatpush1.bf16.msra.mxu1 %v2429_v40  ;;  %v2948_v40 = vld [vmem:[#allocation22_spill] sm:$0xff] }
 0x464   :  { %1175 = vmatprep.subr.bf16.mxu0 %v2431_v41  ;;  %1216 = vmatprep.subr.bf16.mxu1 %v2433_v42 }
 0x467   :  { %1176 = vmatpush1.bf16.msra.mxu0 %v2439_v43  ;;  %1217 = vmatpush1.bf16.msra.mxu1 %v2441_v44 }
 0x468   :  { %1279 = vmatprep.subr.bf16.mxu0 %v2757_v20  ;;  %1320 = vmatprep.subr.bf16.mxu1 %v2760_v21 }
 0x50a   :  { %v1077_v22 = vpop.f32.mrf.mxu0  ;;  %v1118_v23 = vpop.f32.mrf.mxu1 }
 0x50b   :  { %v1125_v25 = vadd.f32 %v1077_v22, %v2945_v24  ;;  %v1127_v41 = vadd.f32 %v1118_v23, %v2948_v40  ;;  %v2831_v22 = vld [vmem:[#allocation6 + $0x20] ss:$16 sps:$4 sm:$0xff]   ;;  %v2834_v23 = vld [vmem:[#allocation6 + $0x28] ss:$16 sps:$4 sm:$0xff]   ;;  %v2837_v24 = vld [vmem:[#allocation6 + $0x4] ss:$16 sps:$4 sm:$0xff]  }
 0x50c   :  { %v1079_v26 = vpop.f32.mrf.mxu0  ;;  %v1120_v27 = vpop.f32.mrf.mxu1 }
 0x50d   :  { %v1816_v28 = vmul.f32 -1.442695, %v1125_v25  ;;  %v1126_v31 = vadd.f32 %v1079_v26, %v2946_v30  ;;  %v1128_v39 = vadd.f32 %v1120_v27, %v2947_v37  ;;  %v2840_v25 = vld [vmem:[#allocation6 + $0xc] ss:$16 sps:$4 sm:$0xff]   ;;  %v2843_v26 = vld [vmem:[#allocation6] ss:$16 sps:$4 sm:$0xff]  }
 0x50e   :  { %v1081_v32 = vpop.f32.mrf.mxu0  ;;  %v1122_v33 = vpop.f32.mrf.mxu1  ;;  %v2846_v27 = vld [vmem:[#allocation6 + $0x8] ss:$16 sps:$4 sm:$0xff]  }
 0x50f   :  { %2059 = vpow2.f32 %v1816_v28  ;;  %v1817_v34 = vmul.f32 -1.442695, %v1126_v31  ;;  %v1818_v42 = vmul.f32 -1.442695, %v1128_v39  ;;  %v2949_v31 = vld [vmem:[#allocation25_spill] sm:$0xff] }
 0x510   :  { %v1082_v35 = vpop.f32.mrf.mxu0  ;;  %v1123_v36 = vpop.f32.mrf.mxu1 }
 0x511   :  { %2061 = vpow2.f32 %v1817_v34  ;;  %v2950_v36 = vld [vmem:[#allocation27_spill] sm:$0xff] }
 0x512   :  { %2063 = vtanh.f32 %v1127_v41 }
 0x513   :  { %2065 = vpow2.f32 %v1818_v42 }
 0x51c   :  { %v2060_v43 = vpop.eup %2059 }
 0x51d   :  { %v1132_v44 = vadd.f32 1.0, %v2060_v43 }
 0x51e   :  { %v2062_v16 = vpop.eup %2061 }
 0x51f   :  { %2067 = vrcp.f32 %v1132_v44  ;;  %v1138_v17 = vadd.f32 1.0, %v2062_v16  ;;  %v2064_v18 = vpop.eup %2063  ;;  %v2951_v44 = vld [vmem:[#allocation28_spill] sm:$0xff]  ;;  %v2952_v16 = vld [vmem:[#allocation26_spill] sm:$0xff] }
 0x520   :  { %v2066_v4 = vpop.eup %2065 }
 0x521   :  { %2069 = vrcp.f32 %v1138_v17  ;;  %v1145_v47 = vadd.f32 1.0, %v2066_v4 }
 0x523   :  { %2071 = vrcp.f32 %v1145_v47 }
 0x52c   :  { %v2068_v59 = vpop.eup %2067 }
 0x52d   :  { %v1149_v8 = vmul.f32 %v2068_v59, %v2064_v18 }
 0x52e   :  { %v2070_v54 = vpop.eup %2069 }
 0x52f   :  { %v1148_v2 = vmul.f32 %v2070_v54, %v2708_v57  ;;  %v2816_v57 = vld [vmem:[#allocation6 + $0x4c] ss:$16 sps:$4 sm:$0xff]  }
 0x530   :  { %v2072_v56 = vpop.eup %2071 }
 0x531   :  { %v2768_v60 = vadd.f32 %v1149_v8, %v1148_v2 }
 0x533   :  { %2073 = vtanh.f32 %v2768_v60 }
 0x540   :  { %v2074_v10 = vpop.eup %2073 }
 0x541   :  { %v1152_v58 = vmul.f32 %v2074_v10, %v2072_v56 }
 0x543   :  { %v1160_v11 = vpack.c.bf16 %v1152_v58, %v1152_v58 }
 0x545   :  { %1194 = vmatmul.mubr.bf16.vlgmr.msra.gmra.mxu0 %v1160_v11  ;;  %1235 = vmatmul.mubr.bf16.vlgmr.msra.gmra.mxu1 %v1160_v11 }
 0x546   :  { %1280 = vmatpush1.bf16.msra.mxu0 %v2711_v45  ;;  %1321 = vmatpush1.bf16.msra.mxu1 %v2714_v49 }
 0x547   :  { %1281 = vmatprep.subr.bf16.mxu0 %v2717_v38  ;;  %1322 = vmatprep.subr.bf16.mxu1 %v2720_v12 }
 0x548   :  { %1311 = vmatprep.mubr.bf16.mxu0 %v2939_v48  ;;  %1352 = vmatprep.mubr.bf16.mxu1 %v2939_v48 }
 0x54a   :  { %1282 = vmatpush1.bf16.msra.mxu0 %v2725_v13  ;;  %1323 = vmatpush1.bf16.msra.mxu1 %v2728_v14 }
 0x54b   :  { %1283 = vmatprep.subr.bf16.mxu0 %v2731_v15  ;;  %1324 = vmatprep.subr.bf16.mxu1 %v2780_v62 }
 0x54e   :  { %1284 = vmatpush1.bf16.msra.mxu0 %v2783_v0  ;;  %1325 = vmatpush1.bf16.msra.mxu1 %v2786_v3 }
 0x54f   :  { %1285 = vmatprep.subr.bf16.mxu0 %v2789_v52  ;;  %1326 = vmatprep.subr.bf16.mxu1 %v2792_v53 }
 0x552   :  { %1286 = vmatpush1.bf16.msra.mxu0 %v2795_v50  ;;  %1327 = vmatpush1.bf16.msra.mxu1 %v2798_v7 }
 0x553   :  { %1287 = vmatprep.subr.bf16.mxu0 %v2801_v51  ;;  %1328 = vmatprep.subr.bf16.mxu1 %v2804_v29 }
 0x556   :  { %1288 = vmatpush1.bf16.msra.mxu0 %v2807_v1  ;;  %1329 = vmatpush1.bf16.msra.mxu1 %v2810_v5 }
 0x557   :  { %1289 = vmatprep.subr.bf16.mxu0 %v2813_v63  ;;  %1330 = vmatprep.subr.bf16.mxu1 %v2816_v57 }
 0x55a   :  { %1290 = vmatpush1.bf16.msra.mxu0 %v2819_v55  ;;  %1331 = vmatpush1.bf16.msra.mxu1 %v2822_v61 }
 0x55b   :  { %1291 = vmatprep.subr.bf16.mxu0 %v2825_v46  ;;  %1332 = vmatprep.subr.bf16.mxu1 %v2828_v19 }
 0x55e   :  { %1292 = vmatpush1.bf16.msra.mxu0 %v2831_v22  ;;  %1333 = vmatpush1.bf16.msra.mxu1 %v2834_v23 }
 0x55f   :  { %1293 = vmatprep.subr.bf16.mxu0 %v2837_v24  ;;  %1334 = vmatprep.subr.bf16.mxu1 %v2840_v25 }
 0x562   :  { %1294 = vmatpush1.bf16.msra.mxu0 %v2843_v26  ;;  %1335 = vmatpush1.bf16.msra.mxu1 %v2846_v27 }
 0x563   :  { %1397 = vmatprep.subr.bf16.mxu0 %v2757_v20  ;;  %1438 = vmatprep.subr.bf16.mxu1 %v2760_v21 }
 0x605   :  { %v1195_v28 = vpop.f32.mrf.mxu0  ;;  %v1236_v30 = vpop.f32.mrf.mxu1 }
 0x606   :  { %v1243_v32 = vadd.f32 %v1195_v28, %v2949_v31  ;;  %v1245_v21 = vadd.f32 %v1236_v30, %v2952_v16  ;;  %v1986_v16 = vld [vmem:[#allocation9 + $0x20] sm:$0xff]  }
 0x607   :  { %v1197_v33 = vpop.f32.mrf.mxu0  ;;  %v1238_v34 = vpop.f32.mrf.mxu1 }
 0x608   :  { %v1819_v35 = vmul.f32 -1.442695, %v1243_v32  ;;  %v1244_v37 = vadd.f32 %v1197_v33, %v2950_v36  ;;  %v1246_v20 = vadd.f32 %v1238_v34, %v2951_v44  ;;  %v1984_v44 = vld [vmem:[#allocation9 + $0x28] sm:$0xff]  }
 0x609   :  { %v1199_v39 = vpop.f32.mrf.mxu0  ;;  %v1240_v40 = vpop.f32.mrf.mxu1 }
 0x60a   :  { %2075 = vpow2.f32 %v1819_v35  ;;  %v1820_v41 = vmul.f32 -1.442695, %v1244_v37  ;;  %v1821_v17 = vmul.f32 -1.442695, %v1246_v20  ;;  %v1979_v37 = vld [vmem:[#allocation8 + $0x38] sm:$0xff]   ;;  %v2272_v39 = vmov 0.0  }
 0x60b   :  { %v1200_v42 = vpop.f32.mrf.mxu0  ;;  %v1241_v43 = vpop.f32.mrf.mxu1  ;;  %v1980_v40 = vld [vmem:[#allocation9 + $0x38] sm:$0xff]   ;;  %v1985_v20 = vld [vmem:[#allocation8 + $0x20] sm:$0xff]  }
 0x60c   :  { %2077 = vpow2.f32 %v1820_v41  ;;  %v1981_v41 = vld [vmem:[#allocation8 + $0x30] sm:$0xff]   ;;  %v1983_v43 = vld [vmem:[#allocation8 + $0x28] sm:$0xff]  }
 0x60d   :  { %2079 = vtanh.f32 %v1245_v21  ;;  %v1982_v42 = vld [vmem:[#allocation9 + $0x30] sm:$0xff]   ;;  %v1987_v21 = vld [vmem:[#allocation8 + $0x18] sm:$0xff]  }
 0x60e   :  { %2081 = vpow2.f32 %v1821_v17  ;;  %v1988_v17 = vld [vmem:[#allocation9 + $0x18] sm:$0xff]  }
 0x617   :  { %v2076_v18 = vpop.eup %2075 }
 0x618   :  { %v1250_v4 = vadd.f32 1.0, %v2076_v18  ;;  %v1989_v18 = vld [vmem:[#allocation8 + $0x10] sm:$0xff]  }
 0x619   :  { %v2078_v59 = vpop.eup %2077 }
 0x61a   :  { %2083 = vrcp.f32 %v1250_v4  ;;  %v1256_v8 = vadd.f32 1.0, %v2078_v59  ;;  %v2080_v54 = vpop.eup %2079  ;;  %v1990_v4 = vld [vmem:[#allocation9 + $0x10] sm:$0xff]   ;;  %v1991_v59 = vld [vmem:[#allocation8 + $0x8] sm:$0xff]  }
 0x61b   :  { %v2082_v47 = vpop.eup %2081 }
 0x61c   :  { %2085 = vrcp.f32 %v1256_v8  ;;  %v1263_v58 = vadd.f32 1.0, %v2082_v47  ;;  %v1992_v8 = vld [vmem:[#allocation9 + $0x8] sm:$0xff]   ;;  %v1994_v47 = vld [vmem:[#allocation9] sm:$0xff]  }
 0x61e   :  { %2087 = vrcp.f32 %v1263_v58 }
 0x627   :  { %v2084_v2 = vpop.eup %2083 }
 0x628   :  { %v1267_v56 = vmul.f32 %v2084_v2, %v2080_v54  ;;  %v1993_v54 = vld [vmem:[#allocation8] sm:$0xff]  }
 0x629   :  { %v2086_v10 = vpop.eup %2085 }
 0x62a   :  { %v1266_v11 = vmul.f32 %v2086_v10, %v2768_v60  ;;  %v2957_v10 = vld [vmem:[#allocation33_spill] sm:$0xff] }
 0x62b   :  { %v2088_v30 = vpop.eup %2087 }
 0x62c   :  { %v2856_v28 = vadd.f32 %v1267_v56, %v1266_v11 }
 0x62e   :  { %2089 = vtanh.f32 %v2856_v28 }
 0x63b   :  { %v2090_v31 = vpop.eup %2089 }
 0x63c   :  { %v1270_v32 = vmul.f32 %v2090_v31, %v2088_v30 }
 0x63e   :  { %v1278_v33 = vpack.c.bf16 %v1270_v32, %v1270_v32 }
 0x640   :  { %1312 = vmatmul.mubr.bf16.vlgmr.msra.gmra.mxu0 %v1278_v33  ;;  %1353 = vmatmul.mubr.bf16.vlgmr.msra.gmra.mxu1 %v1278_v33 }
 0x641   :  { %1398 = vmatpush1.bf16.msra.mxu0 %v2711_v45  ;;  %1439 = vmatpush1.bf16.msra.mxu1 %v2714_v49  ;;  %v2953_v49 = vld [vmem:[#allocation29_spill] sm:$0xff] }
 0x642   :  { %1399 = vmatprep.subr.bf16.mxu0 %v2717_v38  ;;  %1440 = vmatprep.subr.bf16.mxu1 %v2720_v12 }
 0x643   :  { %1429 = vmatprep.mubr.bf16.mxu0 %v2939_v48  ;;  %1470 = vmatprep.mubr.bf16.mxu1 %v2939_v48 }
 0x645   :  { %1400 = vmatpush1.bf16.msra.mxu0 %v2725_v13  ;;  %1441 = vmatpush1.bf16.msra.mxu1 %v2728_v14 }
 0x646   :  { %1401 = vmatprep.subr.bf16.mxu0 %v2731_v15  ;;  %1442 = vmatprep.subr.bf16.mxu1 %v2780_v62  ;;  %v2954_v15 = vld [vmem:[#allocation31_spill] sm:$0xff] }
 0x649   :  { %1402 = vmatpush1.bf16.msra.mxu0 %v2783_v0  ;;  %1443 = vmatpush1.bf16.msra.mxu1 %v2786_v3 }
 0x64a   :  { %1403 = vmatprep.subr.bf16.mxu0 %v2789_v52  ;;  %1444 = vmatprep.subr.bf16.mxu1 %v2792_v53 }
 0x64d   :  { %1404 = vmatpush1.bf16.msra.mxu0 %v2795_v50  ;;  %1445 = vmatpush1.bf16.msra.mxu1 %v2798_v7  ;;  %v2955_v50 = vld [vmem:[#allocation32_spill] sm:$0xff] }
 0x64e   :  { %1405 = vmatprep.subr.bf16.mxu0 %v2801_v51  ;;  %1446 = vmatprep.subr.bf16.mxu1 %v2804_v29  ;;  %v2956_v51 = vld [vmem:[#allocation30_spill] sm:$0xff] }
 0x651   :  { %1406 = vmatpush1.bf16.msra.mxu0 %v2807_v1  ;;  %1447 = vmatpush1.bf16.msra.mxu1 %v2810_v5 }
 0x652   :  { %1407 = vmatprep.subr.bf16.mxu0 %v2813_v63  ;;  %1448 = vmatprep.subr.bf16.mxu1 %v2816_v57 }
 0x655   :  { %1408 = vmatpush1.bf16.msra.mxu0 %v2819_v55  ;;  %1449 = vmatpush1.bf16.msra.mxu1 %v2822_v61 }
 0x656   :  { %1409 = vmatprep.subr.bf16.mxu0 %v2825_v46  ;;  %1450 = vmatprep.subr.bf16.mxu1 %v2828_v19 }
 0x659   :  { %1410 = vmatpush1.bf16.msra.mxu0 %v2831_v22  ;;  %1451 = vmatpush1.bf16.msra.mxu1 %v2834_v23 }
 0x65a   :  { %1411 = vmatprep.subr.bf16.mxu0 %v2837_v24  ;;  %1452 = vmatprep.subr.bf16.mxu1 %v2840_v25 }
 0x65d   :  { %1412 = vmatpush1.bf16.msra.mxu0 %v2843_v26  ;;  %1453 = vmatpush1.bf16.msra.mxu1 %v2846_v27 }
 0x65e   :  { %1883 = vmatprep.subr.bf16.mxu1 %v2272_v39  ;;  %1863 = vmatprep.subr.bf16.mxu0 %v2272_v39 }
 0x700   :  { %v1313_v48 = vpop.f32.mrf.mxu0  ;;  %v1354_v45 = vpop.f32.mrf.mxu1 }
 0x701   :  { %v1361_v38 = vadd.f32 %v1313_v48, %v2953_v49  ;;  %v1363_v29 = vadd.f32 %v1354_v45, %v2956_v51 }
 0x702   :  { %v1315_v12 = vpop.f32.mrf.mxu0  ;;  %v1356_v13 = vpop.f32.mrf.mxu1 }
 0x703   :  { %v1822_v14 = vmul.f32 -1.442695, %v1361_v38  ;;  %v1362_v60 = vadd.f32 %v1315_v12, %v2954_v15  ;;  %v1364_v7 = vadd.f32 %v1356_v13, %v2955_v50  ;;  %v2958_v12 = vld [vmem:[#allocation34_spill] sm:$0xff] }
 0x704   :  { %v1317_v62 = vpop.f32.mrf.mxu0  ;;  %v1358_v0 = vpop.f32.mrf.mxu1 }
 0x705   :  { %2091 = vpow2.f32 %v1822_v14  ;;  %v1823_v3 = vmul.f32 -1.442695, %v1362_v60  ;;  %v1824_v1 = vmul.f32 -1.442695, %v1364_v7 }
 0x706   :  { %v1318_v52 = vpop.f32.mrf.mxu0  ;;  %v1359_v53 = vpop.f32.mrf.mxu1 }
 0x707   :  { %2093 = vpow2.f32 %v1823_v3 }
 0x708   :  { %2095 = vtanh.f32 %v1363_v29 }
 0x709   :  { %2097 = vpow2.f32 %v1824_v1 }
 0x712   :  { %v2092_v5 = vpop.eup %2091 }
 0x713   :  { %v1368_v63 = vadd.f32 1.0, %v2092_v5 }
 0x714   :  { %v2094_v57 = vpop.eup %2093 }
 0x715   :  { %2099 = vrcp.f32 %v1368_v63  ;;  %v1374_v55 = vadd.f32 1.0, %v2094_v57  ;;  %v2096_v61 = vpop.eup %2095 }
 0x716   :  { %v2098_v46 = vpop.eup %2097 }
 0x717   :  { %2101 = vrcp.f32 %v1374_v55  ;;  %v1381_v24 = vadd.f32 1.0, %v2098_v46  ;;  %v1844_v46 = vld [vmem:[%s2916_s6] ss:$0 sm:$0xff] }
 0x719   :  { %2103 = vrcp.f32 %v1381_v24 }
 0x722   :  { %v2100_v19 = vpop.eup %2099 }
 0x723   :  { %v1385_v22 = vmul.f32 %v2100_v19, %v2096_v61 }
 0x724   :  { %v2102_v23 = vpop.eup %2101 }
 0x725   :  { %v1384_v25 = vmul.f32 %v2102_v23, %v2856_v28 }
 0x726   :  { %v2104_v27 = vpop.eup %2103 }
 0x727   :  { %v2896_v26 = vadd.f32 %v1385_v22, %v1384_v25 }
 0x729   :  { %2105 = vtanh.f32 %v2896_v26 }
 0x736   :  { %v2106_v34 = vpop.eup %2105 }
 0x737   :  { %v1388_v35 = vmul.f32 %v2106_v34, %v2104_v27 }
 0x739   :  { %v1396_v36 = vpack.c.bf16 %v1388_v35, %v1388_v35 }
 0x73b   :  { %1430 = vmatmul.mubr.bf16.vlgmr.msra.gmra.mxu0 %v1396_v36  ;;  %1471 = vmatmul.mubr.bf16.vlgmr.msra.gmra.mxu1 %v1396_v36 }
 0x73c   :  { %1884 = vmatpush3.bf16.msra.mxu1 %v1979_v37  ;;  %1864 = vmatpush3.bf16.msra.mxu0 %v1980_v40 }
 0x73d   :  { %1885 = vmatprep.subr.bf16.mxu1 %v2272_v39  ;;  %1865 = vmatprep.subr.bf16.mxu0 %v2272_v39 }
 0x73e   :  { %1899 = vmatprep.mubr.msk.bf16.mxu1 %vm2273_vm1, %v2272_v39  ;;  %1879 = vmatprep.mubr.msk.bf16.mxu0 %vm2273_vm1, %v2272_v39 }
 0x740   :  { %1886 = vmatpush3.bf16.msra.mxu1 %v1981_v41  ;;  %1866 = vmatpush3.bf16.msra.mxu0 %v1982_v42 }
 0x741   :  { %1887 = vmatprep.subr.bf16.mxu1 %v2272_v39  ;;  %1867 = vmatprep.subr.bf16.mxu0 %v2272_v39 }
 0x744   :  { %1888 = vmatpush3.bf16.msra.mxu1 %v1983_v43  ;;  %1868 = vmatpush3.bf16.msra.mxu0 %v1984_v44 }
 0x745   :  { %1889 = vmatprep.subr.bf16.mxu1 %v2272_v39  ;;  %1869 = vmatprep.subr.bf16.mxu0 %v2272_v39 }
 0x748   :  { %1890 = vmatpush3.bf16.msra.mxu1 %v1985_v20  ;;  %1870 = vmatpush3.bf16.msra.mxu0 %v1986_v16 }
 0x749   :  { %1891 = vmatprep.subr.bf16.mxu1 %v2272_v39  ;;  %1871 = vmatprep.subr.bf16.mxu0 %v2272_v39 }
 0x74c   :  { %1892 = vmatpush3.bf16.msra.mxu1 %v1987_v21  ;;  %1872 = vmatpush3.bf16.msra.mxu0 %v1988_v17 }
 0x74d   :  { %1893 = vmatprep.subr.bf16.mxu1 %v2272_v39  ;;  %1873 = vmatprep.subr.bf16.mxu0 %v2272_v39 }
 0x750   :  { %1894 = vmatpush3.bf16.msra.mxu1 %v1989_v18  ;;  %1874 = vmatpush3.bf16.msra.mxu0 %v1990_v4 }
 0x751   :  { %1895 = vmatprep.subr.bf16.mxu1 %v2272_v39  ;;  %1875 = vmatprep.subr.bf16.mxu0 %v2272_v39 }
 0x754   :  { %1896 = vmatpush3.bf16.msra.mxu1 %v1991_v59  ;;  %1876 = vmatpush3.bf16.msra.mxu0 %v1992_v8 }
 0x755   :  { %1897 = vmatprep.subr.bf16.mxu1 %v2272_v39  ;;  %1877 = vmatprep.subr.bf16.mxu0 %v2272_v39 }
 0x758   :  { %1898 = vmatpush3.bf16.msra.mxu1 %v1993_v54  ;;  %1878 = vmatpush3.bf16.msra.mxu0 %v1994_v47 }
 0x7fb   :  { %v1431_v2 = vpop.f32.mrf.mxu0  ;;  %v1472_v56 = vpop.f32.mrf.mxu1 }
 0x7fc   :  { %v1479_v58 = vadd.f32 %v1431_v2, %v2957_v10  ;;  %v1481_v13 = vadd.f32 %v1472_v56, %v2958_v12 }
 0x7fd   :  { %v1433_v11 = vpop.f32.mrf.mxu0  ;;  %v1474_v28 = vpop.f32.mrf.mxu1 }
 0x7fe   :  { %v1825_v30 = vmul.f32 -1.442695, %v1479_v58  ;;  %v1480_v31 = vadd.f32 %v1433_v11, %v2572_v6  ;;  %v1482_v38 = vadd.f32 %v1474_v28, %v2575_v9 }
 0x7ff   :  { %v1435_v32 = vpop.f32.mrf.mxu0  ;;  %v1476_v33 = vpop.f32.mrf.mxu1 }
 0x800   :  { %2107 = vpow2.f32 %v1825_v30  ;;  %v1826_v48 = vmul.f32 -1.442695, %v1480_v31  ;;  %v1827_v14 = vmul.f32 -1.442695, %v1482_v38 }
 0x801   :  { %v1436_v45 = vpop.f32.mrf.mxu0  ;;  %v1477_v49 = vpop.f32.mrf.mxu1 }
 0x802   :  { %2109 = vpow2.f32 %v1826_v48 }
 0x803   :  { %2111 = vtanh.f32 %v1481_v13 }
 0x804   :  { %2113 = vpow2.f32 %v1827_v14 }
 0x80d   :  { %v2108_v15 = vpop.eup %2107 }
 0x80e   :  { %v1486_v60 = vadd.f32 1.0, %v2108_v15 }
 0x80f   :  { %v2110_v62 = vpop.eup %2109 }
 0x810   :  { %2115 = vrcp.f32 %v1486_v60  ;;  %v1492_v0 = vadd.f32 1.0, %v2110_v62  ;;  %v2112_v6 = vpop.eup %2111 }
 0x811   :  { %v2114_v3 = vpop.eup %2113 }
 0x812   :  { %2117 = vrcp.f32 %v1492_v0  ;;  %v1499_v7 = vadd.f32 1.0, %v2114_v3 }
 0x814   :  { %2119 = vrcp.f32 %v1499_v7 }
 0x81d   :  { %v2116_v52 = vpop.eup %2115 }
 0x81e   :  { %v1503_v53 = vmul.f32 %v2116_v52, %v2112_v6 }
 0x81f   :  { %v2118_v50 = vpop.eup %2117 }
 0x820   :  { %v1502_v51 = vmul.f32 %v2118_v50, %v2896_v26 }
 0x821   :  { %v2120_v29 = vpop.eup %2119 }
 0x822   :  { %v1504_v9 = vadd.f32 %v1503_v53, %v1502_v51 }
 0x824   :  { %2121 = vtanh.f32 %v1504_v9 }
 0x831   :  { %v2122_v1 = vpop.eup %2121 }
 0x832   :  { %v1506_v5 = vmul.f32 %v2122_v1, %v2120_v29 }
 0x834   :  { %v1507_v63 = vpack.c.bf16 %v1506_v5, %v1506_v5 }
 0x836   :  { %1900 = vmatmul.mubr.bf16.vlgmr.msra.gmra.mxu1 %v1507_v63  ;;  %v1541_v57 = vrot.slane %v1507_v63, 1 }
 0x838   :  { %1880 = vmatmul.mubr.bf16.vlgmr.msra.gmra.mxu0 %v1541_v57 }
 0x8f6   :  { %v1713_v55 = vpop.f32.mrf.mxu1 }
 0x8f8   :  { %v1625_v61 = vpop.f32.mrf.mxu0  ;;  %v1901_v19 = vpop.f32.mrf.mxu1 }
 0x8f9   :  { %v1714_v22 = vadd.f32 %v1713_v55, %v1625_v61 }
 0x8fa   :  { %v1881_v23 = vpop.f32.mrf.mxu0  ;;  %v1716_v24 = vpop.f32.mrf.mxu1 }
 0x8fb   :  { %v1726_v25 = vadd.f32 %v1844_v46, %v1714_v22 }
 0x8fc   :  { %v1628_v26 = vpop.f32.mrf.mxu0  ;;  %v1902_v27 = vpop.f32.mrf.mxu1 }
 0x8fd   :  { %1727 = vst [vmem:[#allocation11] sm:$0x3] %v1726_v25 }
 0x8fe   :  { %v1882_v34 = vpop.f32.mrf.mxu0 }
 0x8ff   :  { %2246 = shalt.err (!%p2243_p10)
}
 0x900   :  { %1737 = dma.vmem_to_hbm [thread:$0]  %s1735_s9, 32, %s2917_s7, [#allocation5]  }
 0x901   :  { %2261 = dma.done.wait [#allocation5], 32  }
 0x902   :  { %2262 = vsyncadd [#allocation5], 4294967264 }
 0x903   :  { %1741 = vsyncpa [#allocation4], 1 }
 0x904   :  { %1742 = vsyncpa [#allocation7], 1 }
 0x905   :  { %1743 = vsyncpa [#allocation10], 1 }
 0x906   :  { %1744 = vsyncpa [#allocation5], 1 }

</bundles_post_ra>
